<compile_context>
chip_gen: v6e
topology: v6e:2x2x1
jax: 0.10.0
libtpu: 0.0.40
codegen_flags: <defaults>
</compile_context>

<pallas_src>
import functools

import jax
import jax.numpy as jnp
from jax.experimental import pallas as pl
from jax.experimental.pallas import tpu as pltpu

DILATIONS = (7, 5, 2, 1)
PAD = max(DILATIONS)          # shared input padding (== max dilation for k=3)
GN_EPS = 1e-5


# ----------------------------------------------------------------------------
# Kernel 1: depthwise dilated 3x3 conv + GroupNorm + stride-2 subsample.
# Grid = (N, 4); one step handles one (batch, chunk) = one GroupNorm group.
# ----------------------------------------------------------------------------
def make_dw_gn_kernel(Cc, H, W, H2, W2, eps):
    def kernel(x_ref, w_ref, b_ref, g_ref, be_ref, sh_ref, sw_ref, o_ref):
        # x_ref:  (1, Cc, H+2*PAD, W+2*PAD)  shared-padded input chunk  VMEM
        # w_ref:  (1, 9*Cc, 1, 1)            depthwise weights, tap-major
        # b_ref:  (1, Cc, 1, 1)              conv bias
        # g_ref:  (1, Cc, 1, 1)              GroupNorm gamma (this group)
        # be_ref: (1, Cc, 1, 1)              GroupNorm beta  (this group)
        # sh_ref: (Cc*H2, Cc*H)              0/1 row (H) stride-2 selector
        # sw_ref: (W, W2)                    0/1 col (W) stride-2 selector
        # o_ref:  (Cc, 1, H2, W2)            normalized, stride-2-sampled out
        ci = pl.program_id(1)

        def make_branch(d):               # d is a Python int -> static slices
            def branch():
                acc = jnp.zeros((Cc, H, W), jnp.float32)
                for ki in range(3):
                    for kj in range(3):
                        hs = PAD + (ki - 1) * d
                        ws = PAD + (kj - 1) * d
                        patch = x_ref[0, :, hs:hs + H, ws:ws + W]   # (Cc,H,W)
                        tap = ki * 3 + kj
                        wt = w_ref[0, tap * Cc:(tap + 1) * Cc]      # (Cc,1,1)
                        acc = acc + patch * wt
                return acc
            return branch

        acc = jax.lax.switch(ci, [make_branch(d) for d in DILATIONS])
        acc = acc + b_ref[0]                                        # (Cc,H,W)

        # GroupNorm over the whole chunk (two-pass for accuracy).
        cnt = jnp.float32(Cc * H * W)
        mean = jnp.sum(acc) / cnt
        cen = acc - mean
        var = jnp.sum(cen * cen) / cnt
        inv = jax.lax.rsqrt(var + jnp.float32(eps))
        norm = cen * inv * g_ref[0] + be_ref[0]                     # (Cc,H,W)

        # Stride-2 spatial subsampling via 0/1 selection matmuls (MXU).
        t = jnp.dot(norm.reshape(Cc * H, W), sw_ref[...],
                    preferred_element_type=jnp.float32)             # (Cc*H,W2)
        out = jnp.dot(sh_ref[...], t,
                      preferred_element_type=jnp.float32)           # (Cc*H2,W2)
        o_ref[:, 0] = out.reshape(Cc, H2, W2)
    return kernel


# ----------------------------------------------------------------------------
# Kernel 2: batched 1x1 stride-2 conv (single matmul over all N) + SE block.
# ----------------------------------------------------------------------------
def pw_se_kernel(u_ref, w_ref, b_ref, e_ref, et_ref, f1_ref, f2_ref, o_ref,
                 *, inv_s):
    # u_ref:  (C, L)       GN output, channels-major, L = N*H2*W2 (lane-dense)
    # w_ref:  (out_c, C)   1x1 conv weight
    # b_ref:  (out_c, 1)   1x1 conv bias
    # e_ref:  (L, N)       batch-segment indicator (for avg pool)
    # et_ref: (N, L)       its transpose (for gate expansion)
    # f1_ref: (hidden, out_c)  SE fc1 weight
    # f2_ref: (out_c, hidden)  SE fc2 weight
    # o_ref:  (out_c, L)
    z = jnp.dot(w_ref[...], u_ref[...], preferred_element_type=jnp.float32)
    z = z + b_ref[...]                                              # (out_c,L)
    pooled = jnp.dot(z, e_ref[...],
                     preferred_element_type=jnp.float32) * inv_s    # (out_c,N)
    h = jnp.maximum(
        jnp.dot(f1_ref[...], pooled, preferred_element_type=jnp.float32), 0.0)
    s = jax.nn.sigmoid(
        jnp.dot(f2_ref[...], h, preferred_element_type=jnp.float32))  # (out_c,N)
    gate = jnp.dot(s, et_ref[...],
                   preferred_element_type=jnp.float32)              # (out_c,L)
    o_ref[...] = z * gate


# ----------------------------------------------------------------------------
# Wrapper
# ----------------------------------------------------------------------------
def dekfofo_forward(x, params):
    N, C, H, W = x.shape
    Cc = C // 4
    H2, W2 = H // 2, W // 2
    S = H2 * W2
    L = N * S

    # Single shared pad (max dilation) instead of four per-chunk pads.
    xpad = jnp.pad(x, ((0, 0), (0, 0), (PAD, PAD), (PAD, PAD)))
    Hp, Wp = H + 2 * PAD, W + 2 * PAD

    # Pack per-chunk parameters (weights tap-major, broadcastable (Cc,1,1)).
    wexp = jnp.stack(
        [params[f"mda{i}_w"].reshape(Cc, 9).T.reshape(9 * Cc) for i in range(4)]
    ).reshape(4, 9 * Cc, 1, 1)
    bexp = jnp.stack([params[f"mda{i}_b"] for i in range(4)]).reshape(4, Cc, 1, 1)
    gexp = params["gn_w"].reshape(4, Cc, 1, 1)
    beexp = params["gn_b"].reshape(4, Cc, 1, 1)

    # 0/1 selection matrices for the in-kernel stride-2 sampling.
    sh = jnp.kron(jnp.eye(Cc, dtype=jnp.float32),
                  jnp.eye(H, dtype=jnp.float32)[::2, :])     # (Cc*H2, Cc*H)
    sw = jnp.eye(W, dtype=jnp.float32)[:, ::2]                # (W, W2)

    kern1 = make_dw_gn_kernel(Cc, H, W, H2, W2, GN_EPS)
    u = pl.pallas_call(
        kern1,
        out_shape=jax.ShapeDtypeStruct((C, N, H2, W2), jnp.float32),
        grid=(N, 4),
        in_specs=[
            pl.BlockSpec((1, Cc, Hp, Wp), lambda n, ci: (n, ci, 0, 0)),
            pl.BlockSpec((1, 9 * Cc, 1, 1), lambda n, ci: (ci, 0, 0, 0)),
            pl.BlockSpec((1, Cc, 1, 1), lambda n, ci: (ci, 0, 0, 0)),
            pl.BlockSpec((1, Cc, 1, 1), lambda n, ci: (ci, 0, 0, 0)),
            pl.BlockSpec((1, Cc, 1, 1), lambda n, ci: (ci, 0, 0, 0)),
            pl.BlockSpec((Cc * H2, Cc * H), lambda n, ci: (0, 0)),
            pl.BlockSpec((W, W2), lambda n, ci: (0, 0)),
        ],
        out_specs=pl.BlockSpec((Cc, 1, H2, W2), lambda n, ci: (ci, n, 0, 0)),
        compiler_params=pltpu.CompilerParams(
            dimension_semantics=("parallel", "parallel")),
    )(xpad, wexp, bexp, gexp, beexp, sh, sw)

    # (C, N, H2, W2) -> (C, N*S): contiguous metadata-only reshape.
    u2 = u.reshape(C, L)

    out_c = params["conv_w"].shape[0]
    hidden = params["fc1_w"].shape[0]
    w1 = params["conv_w"].reshape(out_c, C)
    bconv = params["conv_b"].reshape(out_c, 1)
    e = jnp.repeat(jnp.eye(N, dtype=jnp.float32), S, axis=0)  # (L, N)
    et = e.T                                                   # (N, L)

    kern2 = functools.partial(pw_se_kernel, inv_s=1.0 / float(S))
    z = pl.pallas_call(
        kern2,
        out_shape=jax.ShapeDtypeStruct((out_c, L), jnp.float32),
        grid=(1,),
        in_specs=[
            pl.BlockSpec((C, L), lambda i: (0, 0)),
            pl.BlockSpec((out_c, C), lambda i: (0, 0)),
            pl.BlockSpec((out_c, 1), lambda i: (0, 0)),
            pl.BlockSpec((L, N), lambda i: (0, 0)),
            pl.BlockSpec((N, L), lambda i: (0, 0)),
            pl.BlockSpec((hidden, out_c), lambda i: (0, 0)),
            pl.BlockSpec((out_c, hidden), lambda i: (0, 0)),
        ],
        out_specs=pl.BlockSpec((out_c, L), lambda i: (0, 0)),
        compiler_params=pltpu.CompilerParams(
            dimension_semantics=("arbitrary",)),
    )(u2, w1, bconv, e, et, params["fc1_w"], params["fc2_w"])

    # (out_c, N*S) -> (N, out_c, H2, W2)
    return z.reshape(out_c, N, H2, W2).transpose(1, 0, 2, 3)


# ----------------------------------------------------------------------------
# Pure-JAX reference (mirrors the PyTorch module), for correctness checking.
# ----------------------------------------------------------------------------
def dekfofo_reference(x, params):
    N, C, H, W = x.shape
    Cc = C // 4
    outs = []
    for i, d in enumerate(DILATIONS):
        xi = x[:, i * Cc:(i + 1) * Cc]
        w = params[f"mda{i}_w"]                      # (Cc, 1, 3, 3)
        b = params[f"mda{i}_b"]
        yi = jax.lax.conv_general_dilated(
            xi, w, window_strides=(1, 1), padding=[(d, d), (d, d)],
            rhs_dilation=(d, d), feature_group_count=Cc,
            dimension_numbers=("NCHW", "OIHW", "NCHW"))
        outs.append(yi + b[None, :, None, None])
    u = jnp.concatenate(outs, axis=1)
    g = u.reshape(N, 4, Cc, H, W)
    mean = g.mean(axis=(2, 3, 4), keepdims=True)
    var = g.var(axis=(2, 3, 4), keepdims=True)
    gn = ((g - mean) / jnp.sqrt(var + GN_EPS)).reshape(N, C, H, W)
    gn = gn * params["gn_w"][None, :, None, None] + params["gn_b"][None, :, None, None]
    us = gn[:, :, ::2, ::2]
    out_c = params["conv_w"].shape[0]
    z = jnp.einsum("oc,nchw->nohw", params["conv_w"].reshape(out_c, C), us)
    z = z + params["conv_b"][None, :, None, None]
    y = z.mean(axis=(2, 3))                          # (N, out_c)
    y = jnp.maximum(y @ params["fc1_w"].T, 0.0)
    y = jax.nn.sigmoid(y @ params["fc2_w"].T)
    return z * y[:, :, None, None]


def init_params(key, in_c, out_c, reduction=16):
    Cc = in_c // 4
    hidden = out_c // reduction
    keys = jax.random.split(key, 16)
    p = {}
    for i in range(4):
        p[f"mda{i}_w"] = 0.1 * jax.random.normal(keys[i], (Cc, 1, 3, 3), jnp.float32)
        p[f"mda{i}_b"] = 0.1 * jax.random.normal(keys[4 + i], (Cc,), jnp.float32)
    p["gn_w"] = 1.0 + 0.1 * jax.random.normal(keys[8], (in_c,), jnp.float32)
    p["gn_b"] = 0.1 * jax.random.normal(keys[9], (in_c,), jnp.float32)
    p["conv_w"] = 0.1 * jax.random.normal(keys[10], (out_c, in_c, 1, 1), jnp.float32)
    p["conv_b"] = 0.1 * jax.random.normal(keys[11], (out_c,), jnp.float32)
    p["fc1_w"] = 0.1 * jax.random.normal(keys[12], (hidden, out_c), jnp.float32)
    p["fc2_w"] = 0.1 * jax.random.normal(keys[13], (out_c, hidden), jnp.float32)
    return p


if __name__ == "__main__":
    # Small shapes consistent with the module: in_c divisible by 4,
    # out_c divisible by 16 (SE reduction), even spatial dims for stride 2.
    N, in_c, out_c, H, W = 2, 8, 32, 16, 16
    key = jax.random.PRNGKey(0)
    kx, kp = jax.random.split(key)
    x = jax.random.normal(kx, (N, in_c, H, W), jnp.float32)
    params = init_params(kp, in_c, out_c)

    out = dekfofo_forward(x, params)
    out = jax.block_until_ready(out)

    ref = dekfofo_reference(x, params)
    assert out.shape == (N, out_c, H // 2, W // 2), out.shape
    assert jnp.allclose(out, ref, rtol=1e-3, atol=1e-3), (
        float(jnp.max(jnp.abs(out - ref))))

    print("KERNEL_OK")
</pallas_src>

<mosaic_0001>
module attributes {stable_mosaic.version = 11 : i64} {
  func.func @kernel(%arg0: i32, %arg1: i32, %arg2: memref<1x2x30x30xf32, #tpu.memory_space<vmem>>, %arg3: memref<1x18x1x1xf32, #tpu.memory_space<vmem>>, %arg4: memref<1x2x1x1xf32, #tpu.memory_space<vmem>>, %arg5: memref<1x2x1x1xf32, #tpu.memory_space<vmem>>, %arg6: memref<1x2x1x1xf32, #tpu.memory_space<vmem>>, %arg7: memref<16x32xf32, #tpu.memory_space<vmem>>, %arg8: memref<16x8xf32, #tpu.memory_space<vmem>>, %arg9: memref<2x1x8x8xf32, #tpu.memory_space<vmem>>) attributes {dimension_semantics = [#tpu.dimension_semantics<parallel>, #tpu.dimension_semantics<parallel>], iteration_bounds = array<i64: 2, 4>, scalar_prefetch = 0 : i64, scratch_operands = 0 : i64, tpu.core_type = #tpu.core_type<tc>, window_params = [{transform_indices = @transform_0, window_bounds = array<i64: 1, 2, 30, 30>}, {transform_indices = @transform_1, window_bounds = array<i64: 1, 18, 1, 1>}, {transform_indices = @transform_2, window_bounds = array<i64: 1, 2, 1, 1>}, {transform_indices = @transform_3, window_bounds = array<i64: 1, 2, 1, 1>}, {transform_indices = @transform_4, window_bounds = array<i64: 1, 2, 1, 1>}, {pipeline_mode = #tpu.pipeline_mode<synchronous>, transform_indices = @transform_5, window_bounds = array<i64: 16, 32>}, {pipeline_mode = #tpu.pipeline_mode<synchronous>, transform_indices = @transform_6, window_bounds = array<i64: 16, 8>}, {transform_indices = @transform_7, window_bounds = array<i64: 2, 1, 8, 8>}]} {
    %c0_i32 = arith.constant 0 : i32
    %c3_i32 = arith.constant 3 : i32
    %0 = arith.maxsi %arg1, %c0_i32 : i32
    %1 = arith.minsi %0, %c3_i32 : i32
    %c0_i32_0 = arith.constant 0 : i32
    %2 = arith.cmpi ne, %1, %c0_i32_0 : i32
    %3 = scf.if %2 -> (vector<2x16x16xf32>) {
      %c1_i32 = arith.constant 1 : i32
      %42 = arith.subi %1, %c1_i32 : i32
      %c0_i32_26 = arith.constant 0 : i32
      %43 = arith.cmpi ne, %42, %c0_i32_26 : i32
      %44 = scf.if %43 -> (vector<2x16x16xf32>) {
        %c1_i32_27 = arith.constant 1 : i32
        %45 = arith.subi %42, %c1_i32_27 : i32
        %c0_i32_28 = arith.constant 0 : i32
        %46 = arith.cmpi ne, %45, %c0_i32_28 : i32
        %47 = scf.if %46 -> (vector<2x16x16xf32>) {
          %cst_29 = arith.constant 0.000000e+00 : f32
          %48 = vector.broadcast %cst_29 : f32 to vector<2x16x16xf32>
          %c0_30 = arith.constant 0 : index
          %c0_31 = arith.constant 0 : index
          %c6 = arith.constant 6 : index
          %c6_32 = arith.constant 6 : index
          %49 = vector.load %arg2[%c0_30, %c0_31, %c6, %c6_32] : memref<1x2x30x30xf32, #tpu.memory_space<vmem>>, vector<1x2x16x16xf32>
          %50 = vector.shape_cast %49 : vector<1x2x16x16xf32> to vector<2x16x16xf32>
          %c0_33 = arith.constant 0 : index
          %c0_34 = arith.constant 0 : index
          %c0_35 = arith.constant 0 : index
          %c0_36 = arith.constant 0 : index
          %51 = vector.load %arg3[%c0_33, %c0_34, %c0_35, %c0_36] : memref<1x18x1x1xf32, #tpu.memory_space<vmem>>, vector<1x2x1x1xf32>
          %52 = vector.shape_cast %51 : vector<1x2x1x1xf32> to vector<2x1x1xf32>
          %53 = vector.broadcast %52 : vector<2x1x1xf32> to vector<2x16x16xf32>
          %54 = arith.mulf %50, %53 : vector<2x16x16xf32>
          %55 = arith.addf %48, %54 : vector<2x16x16xf32>
          %c0_37 = arith.constant 0 : index
          %c0_38 = arith.constant 0 : index
          %c6_39 = arith.constant 6 : index
          %c7 = arith.constant 7 : index
          %56 = vector.load %arg2[%c0_37, %c0_38, %c6_39, %c7] : memref<1x2x30x30xf32, #tpu.memory_space<vmem>>, vector<1x2x16x16xf32>
          %57 = vector.shape_cast %56 : vector<1x2x16x16xf32> to vector<2x16x16xf32>
          %c0_40 = arith.constant 0 : index
          %c2 = arith.constant 2 : index
          %c0_41 = arith.constant 0 : index
          %c0_42 = arith.constant 0 : index
          %58 = vector.load %arg3[%c0_40, %c2, %c0_41, %c0_42] : memref<1x18x1x1xf32, #tpu.memory_space<vmem>>, vector<1x2x1x1xf32>
          %59 = vector.shape_cast %58 : vector<1x2x1x1xf32> to vector<2x1x1xf32>
          %60 = vector.broadcast %59 : vector<2x1x1xf32> to vector<2x16x16xf32>
          %61 = arith.mulf %57, %60 : vector<2x16x16xf32>
          %62 = arith.addf %55, %61 : vector<2x16x16xf32>
          %c0_43 = arith.constant 0 : index
          %c0_44 = arith.constant 0 : index
          %c6_45 = arith.constant 6 : index
          %c8 = arith.constant 8 : index
          %63 = vector.load %arg2[%c0_43, %c0_44, %c6_45, %c8] : memref<1x2x30x30xf32, #tpu.memory_space<vmem>>, vector<1x2x16x16xf32>
          %64 = vector.shape_cast %63 : vector<1x2x16x16xf32> to vector<2x16x16xf32>
          %c0_46 = arith.constant 0 : index
          %c4 = arith.constant 4 : index
          %c0_47 = arith.constant 0 : index
          %c0_48 = arith.constant 0 : index
          %65 = vector.load %arg3[%c0_46, %c4, %c0_47, %c0_48] : memref<1x18x1x1xf32, #tpu.memory_space<vmem>>, vector<1x2x1x1xf32>
          %66 = vector.shape_cast %65 : vector<1x2x1x1xf32> to vector<2x1x1xf32>
          %67 = vector.broadcast %66 : vector<2x1x1xf32> to vector<2x16x16xf32>
          %68 = arith.mulf %64, %67 : vector<2x16x16xf32>
          %69 = arith.addf %62, %68 : vector<2x16x16xf32>
          %c0_49 = arith.constant 0 : index
          %c0_50 = arith.constant 0 : index
          %c7_51 = arith.constant 7 : index
          %c6_52 = arith.constant 6 : index
          %70 = vector.load %arg2[%c0_49, %c0_50, %c7_51, %c6_52] : memref<1x2x30x30xf32, #tpu.memory_space<vmem>>, vector<1x2x16x16xf32>
          %71 = vector.shape_cast %70 : vector<1x2x16x16xf32> to vector<2x16x16xf32>
          %c0_53 = arith.constant 0 : index
          %c6_54 = arith.constant 6 : index
          %c0_55 = arith.constant 0 : index
          %c0_56 = arith.constant 0 : index
          %72 = vector.load %arg3[%c0_53, %c6_54, %c0_55, %c0_56] : memref<1x18x1x1xf32, #tpu.memory_space<vmem>>, vector<1x2x1x1xf32>
          %73 = vector.shape_cast %72 : vector<1x2x1x1xf32> to vector<2x1x1xf32>
          %74 = vector.broadcast %73 : vector<2x1x1xf32> to vector<2x16x16xf32>
          %75 = arith.mulf %71, %74 : vector<2x16x16xf32>
          %76 = arith.addf %69, %75 : vector<2x16x16xf32>
          %c0_57 = arith.constant 0 : index
          %c0_58 = arith.constant 0 : index
          %c7_59 = arith.constant 7 : index
          %c7_60 = arith.constant 7 : index
          %77 = vector.load %arg2[%c0_57, %c0_58, %c7_59, %c7_60] : memref<1x2x30x30xf32, #tpu.memory_space<vmem>>, vector<1x2x16x16xf32>
          %78 = vector.shape_cast %77 : vector<1x2x16x16xf32> to vector<2x16x16xf32>
          %c0_61 = arith.constant 0 : index
          %c8_62 = arith.constant 8 : index
          %c0_63 = arith.constant 0 : index
          %c0_64 = arith.constant 0 : index
          %79 = vector.load %arg3[%c0_61, %c8_62, %c0_63, %c0_64] : memref<1x18x1x1xf32, #tpu.memory_space<vmem>>, vector<1x2x1x1xf32>
          %80 = vector.shape_cast %79 : vector<1x2x1x1xf32> to vector<2x1x1xf32>
          %81 = vector.broadcast %80 : vector<2x1x1xf32> to vector<2x16x16xf32>
          %82 = arith.mulf %78, %81 : vector<2x16x16xf32>
          %83 = arith.addf %76, %82 : vector<2x16x16xf32>
          %c0_65 = arith.constant 0 : index
          %c0_66 = arith.constant 0 : index
          %c7_67 = arith.constant 7 : index
          %c8_68 = arith.constant 8 : index
          %84 = vector.load %arg2[%c0_65, %c0_66, %c7_67, %c8_68] : memref<1x2x30x30xf32, #tpu.memory_space<vmem>>, vector<1x2x16x16xf32>
          %85 = vector.shape_cast %84 : vector<1x2x16x16xf32> to vector<2x16x16xf32>
          %c0_69 = arith.constant 0 : index
          %c10 = arith.constant 10 : index
          %c0_70 = arith.constant 0 : index
          %c0_71 = arith.constant 0 : index
          %86 = vector.load %arg3[%c0_69, %c10, %c0_70, %c0_71] : memref<1x18x1x1xf32, #tpu.memory_space<vmem>>, vector<1x2x1x1xf32>
          %87 = vector.shape_cast %86 : vector<1x2x1x1xf32> to vector<2x1x1xf32>
          %88 = vector.broadcast %87 : vector<2x1x1xf32> to vector<2x16x16xf32>
          %89 = arith.mulf %85, %88 : vector<2x16x16xf32>
          %90 = arith.addf %83, %89 : vector<2x16x16xf32>
          %c0_72 = arith.constant 0 : index
          %c0_73 = arith.constant 0 : index
          %c8_74 = arith.constant 8 : index
          %c6_75 = arith.constant 6 : index
          %91 = vector.load %arg2[%c0_72, %c0_73, %c8_74, %c6_75] : memref<1x2x30x30xf32, #tpu.memory_space<vmem>>, vector<1x2x16x16xf32>
          %92 = vector.shape_cast %91 : vector<1x2x16x16xf32> to vector<2x16x16xf32>
          %c0_76 = arith.constant 0 : index
          %c12 = arith.constant 12 : index
          %c0_77 = arith.constant 0 : index
          %c0_78 = arith.constant 0 : index
          %93 = vector.load %arg3[%c0_76, %c12, %c0_77, %c0_78] : memref<1x18x1x1xf32, #tpu.memory_space<vmem>>, vector<1x2x1x1xf32>
          %94 = vector.shape_cast %93 : vector<1x2x1x1xf32> to vector<2x1x1xf32>
          %95 = vector.broadcast %94 : vector<2x1x1xf32> to vector<2x16x16xf32>
          %96 = arith.mulf %92, %95 : vector<2x16x16xf32>
          %97 = arith.addf %90, %96 : vector<2x16x16xf32>
          %c0_79 = arith.constant 0 : index
          %c0_80 = arith.constant 0 : index
          %c8_81 = arith.constant 8 : index
          %c7_82 = arith.constant 7 : index
          %98 = vector.load %arg2[%c0_79, %c0_80, %c8_81, %c7_82] : memref<1x2x30x30xf32, #tpu.memory_space<vmem>>, vector<1x2x16x16xf32>
          %99 = vector.shape_cast %98 : vector<1x2x16x16xf32> to vector<2x16x16xf32>
          %c0_83 = arith.constant 0 : index
          %c14 = arith.constant 14 : index
          %c0_84 = arith.constant 0 : index
          %c0_85 = arith.constant 0 : index
          %100 = vector.load %arg3[%c0_83, %c14, %c0_84, %c0_85] : memref<1x18x1x1xf32, #tpu.memory_space<vmem>>, vector<1x2x1x1xf32>
          %101 = vector.shape_cast %100 : vector<1x2x1x1xf32> to vector<2x1x1xf32>
          %102 = vector.broadcast %101 : vector<2x1x1xf32> to vector<2x16x16xf32>
          %103 = arith.mulf %99, %102 : vector<2x16x16xf32>
          %104 = arith.addf %97, %103 : vector<2x16x16xf32>
          %c0_86 = arith.constant 0 : index
          %c0_87 = arith.constant 0 : index
          %c8_88 = arith.constant 8 : index
          %c8_89 = arith.constant 8 : index
          %105 = vector.load %arg2[%c0_86, %c0_87, %c8_88, %c8_89] : memref<1x2x30x30xf32, #tpu.memory_space<vmem>>, vector<1x2x16x16xf32>
          %106 = vector.shape_cast %105 : vector<1x2x16x16xf32> to vector<2x16x16xf32>
          %c0_90 = arith.constant 0 : index
          %c16 = arith.constant 16 : index
          %c0_91 = arith.constant 0 : index
          %c0_92 = arith.constant 0 : index
          %107 = vector.load %arg3[%c0_90, %c16, %c0_91, %c0_92] : memref<1x18x1x1xf32, #tpu.memory_space<vmem>>, vector<1x2x1x1xf32>
          %108 = vector.shape_cast %107 : vector<1x2x1x1xf32> to vector<2x1x1xf32>
          %109 = vector.broadcast %108 : vector<2x1x1xf32> to vector<2x16x16xf32>
          %110 = arith.mulf %106, %109 : vector<2x16x16xf32>
          %111 = arith.addf %104, %110 : vector<2x16x16xf32>
          scf.yield %111 : vector<2x16x16xf32>
        } else {
          %cst_29 = arith.constant 0.000000e+00 : f32
          %48 = vector.broadcast %cst_29 : f32 to vector<2x16x16xf32>
          %c0_30 = arith.constant 0 : index
          %c0_31 = arith.constant 0 : index
          %c5 = arith.constant 5 : index
          %c5_32 = arith.constant 5 : index
          %49 = vector.load %arg2[%c0_30, %c0_31, %c5, %c5_32] : memref<1x2x30x30xf32, #tpu.memory_space<vmem>>, vector<1x2x16x16xf32>
          %50 = vector.shape_cast %49 : vector<1x2x16x16xf32> to vector<2x16x16xf32>
          %c0_33 = arith.constant 0 : index
          %c0_34 = arith.constant 0 : index
          %c0_35 = arith.constant 0 : index
          %c0_36 = arith.constant 0 : index
          %51 = vector.load %arg3[%c0_33, %c0_34, %c0_35, %c0_36] : memref<1x18x1x1xf32, #tpu.memory_space<vmem>>, vector<1x2x1x1xf32>
          %52 = vector.shape_cast %51 : vector<1x2x1x1xf32> to vector<2x1x1xf32>
          %53 = vector.broadcast %52 : vector<2x1x1xf32> to vector<2x16x16xf32>
          %54 = arith.mulf %50, %53 : vector<2x16x16xf32>
          %55 = arith.addf %48, %54 : vector<2x16x16xf32>
          %c0_37 = arith.constant 0 : index
          %c0_38 = arith.constant 0 : index
          %c5_39 = arith.constant 5 : index
          %c7 = arith.constant 7 : index
          %56 = vector.load %arg2[%c0_37, %c0_38, %c5_39, %c7] : memref<1x2x30x30xf32, #tpu.memory_space<vmem>>, vector<1x2x16x16xf32>
          %57 = vector.shape_cast %56 : vector<1x2x16x16xf32> to vector<2x16x16xf32>
          %c0_40 = arith.constant 0 : index
          %c2 = arith.constant 2 : index
          %c0_41 = arith.constant 0 : index
          %c0_42 = arith.constant 0 : index
          %58 = vector.load %arg3[%c0_40, %c2, %c0_41, %c0_42] : memref<1x18x1x1xf32, #tpu.memory_space<vmem>>, vector<1x2x1x1xf32>
          %59 = vector.shape_cast %58 : vector<1x2x1x1xf32> to vector<2x1x1xf32>
          %60 = vector.broadcast %59 : vector<2x1x1xf32> to vector<2x16x16xf32>
          %61 = arith.mulf %57, %60 : vector<2x16x16xf32>
          %62 = arith.addf %55, %61 : vector<2x16x16xf32>
          %c0_43 = arith.constant 0 : index
          %c0_44 = arith.constant 0 : index
          %c5_45 = arith.constant 5 : index
          %c9 = arith.constant 9 : index
          %63 = vector.load %arg2[%c0_43, %c0_44, %c5_45, %c9] : memref<1x2x30x30xf32, #tpu.memory_space<vmem>>, vector<1x2x16x16xf32>
          %64 = vector.shape_cast %63 : vector<1x2x16x16xf32> to vector<2x16x16xf32>
          %c0_46 = arith.constant 0 : index
          %c4 = arith.constant 4 : index
          %c0_47 = arith.constant 0 : index
          %c0_48 = arith.constant 0 : index
          %65 = vector.load %arg3[%c0_46, %c4, %c0_47, %c0_48] : memref<1x18x1x1xf32, #tpu.memory_space<vmem>>, vector<1x2x1x1xf32>
          %66 = vector.shape_cast %65 : vector<1x2x1x1xf32> to vector<2x1x1xf32>
          %67 = vector.broadcast %66 : vector<2x1x1xf32> to vector<2x16x16xf32>
          %68 = arith.mulf %64, %67 : vector<2x16x16xf32>
          %69 = arith.addf %62, %68 : vector<2x16x16xf32>
          %c0_49 = arith.constant 0 : index
          %c0_50 = arith.constant 0 : index
          %c7_51 = arith.constant 7 : index
          %c5_52 = arith.constant 5 : index
          %70 = vector.load %arg2[%c0_49, %c0_50, %c7_51, %c5_52] : memref<1x2x30x30xf32, #tpu.memory_space<vmem>>, vector<1x2x16x16xf32>
          %71 = vector.shape_cast %70 : vector<1x2x16x16xf32> to vector<2x16x16xf32>
          %c0_53 = arith.constant 0 : index
          %c6 = arith.constant 6 : index
          %c0_54 = arith.constant 0 : index
          %c0_55 = arith.constant 0 : index
          %72 = vector.load %arg3[%c0_53, %c6, %c0_54, %c0_55] : memref<1x18x1x1xf32, #tpu.memory_space<vmem>>, vector<1x2x1x1xf32>
          %73 = vector.shape_cast %72 : vector<1x2x1x1xf32> to vector<2x1x1xf32>
          %74 = vector.broadcast %73 : vector<2x1x1xf32> to vector<2x16x16xf32>
          %75 = arith.mulf %71, %74 : vector<2x16x16xf32>
          %76 = arith.addf %69, %75 : vector<2x16x16xf32>
          %c0_56 = arith.constant 0 : index
          %c0_57 = arith.constant 0 : index
          %c7_58 = arith.constant 7 : index
          %c7_59 = arith.constant 7 : index
          %77 = vector.load %arg2[%c0_56, %c0_57, %c7_58, %c7_59] : memref<1x2x30x30xf32, #tpu.memory_space<vmem>>, vector<1x2x16x16xf32>
          %78 = vector.shape_cast %77 : vector<1x2x16x16xf32> to vector<2x16x16xf32>
          %c0_60 = arith.constant 0 : index
          %c8 = arith.constant 8 : index
          %c0_61 = arith.constant 0 : index
          %c0_62 = arith.constant 0 : index
          %79 = vector.load %arg3[%c0_60, %c8, %c0_61, %c0_62] : memref<1x18x1x1xf32, #tpu.memory_space<vmem>>, vector<1x2x1x1xf32>
          %80 = vector.shape_cast %79 : vector<1x2x1x1xf32> to vector<2x1x1xf32>
          %81 = vector.broadcast %80 : vector<2x1x1xf32> to vector<2x16x16xf32>
          %82 = arith.mulf %78, %81 : vector<2x16x16xf32>
          %83 = arith.addf %76, %82 : vector<2x16x16xf32>
          %c0_63 = arith.constant 0 : index
          %c0_64 = arith.constant 0 : index
          %c7_65 = arith.constant 7 : index
          %c9_66 = arith.constant 9 : index
          %84 = vector.load %arg2[%c0_63, %c0_64, %c7_65, %c9_66] : memref<1x2x30x30xf32, #tpu.memory_space<vmem>>, vector<1x2x16x16xf32>
          %85 = vector.shape_cast %84 : vector<1x2x16x16xf32> to vector<2x16x16xf32>
          %c0_67 = arith.constant 0 : index
          %c10 = arith.constant 10 : index
          %c0_68 = arith.constant 0 : index
          %c0_69 = arith.constant 0 : index
          %86 = vector.load %arg3[%c0_67, %c10, %c0_68, %c0_69] : memref<1x18x1x1xf32, #tpu.memory_space<vmem>>, vector<1x2x1x1xf32>
          %87 = vector.shape_cast %86 : vector<1x2x1x1xf32> to vector<2x1x1xf32>
          %88 = vector.broadcast %87 : vector<2x1x1xf32> to vector<2x16x16xf32>
          %89 = arith.mulf %85, %88 : vector<2x16x16xf32>
          %90 = arith.addf %83, %89 : vector<2x16x16xf32>
          %c0_70 = arith.constant 0 : index
          %c0_71 = arith.constant 0 : index
          %c9_72 = arith.constant 9 : index
          %c5_73 = arith.constant 5 : index
          %91 = vector.load %arg2[%c0_70, %c0_71, %c9_72, %c5_73] : memref<1x2x30x30xf32, #tpu.memory_space<vmem>>, vector<1x2x16x16xf32>
          %92 = vector.shape_cast %91 : vector<1x2x16x16xf32> to vector<2x16x16xf32>
          %c0_74 = arith.constant 0 : index
          %c12 = arith.constant 12 : index
          %c0_75 = arith.constant 0 : index
          %c0_76 = arith.constant 0 : index
          %93 = vector.load %arg3[%c0_74, %c12, %c0_75, %c0_76] : memref<1x18x1x1xf32, #tpu.memory_space<vmem>>, vector<1x2x1x1xf32>
          %94 = vector.shape_cast %93 : vector<1x2x1x1xf32> to vector<2x1x1xf32>
          %95 = vector.broadcast %94 : vector<2x1x1xf32> to vector<2x16x16xf32>
          %96 = arith.mulf %92, %95 : vector<2x16x16xf32>
          %97 = arith.addf %90, %96 : vector<2x16x16xf32>
          %c0_77 = arith.constant 0 : index
          %c0_78 = arith.constant 0 : index
          %c9_79 = arith.constant 9 : index
          %c7_80 = arith.constant 7 : index
          %98 = vector.load %arg2[%c0_77, %c0_78, %c9_79, %c7_80] : memref<1x2x30x30xf32, #tpu.memory_space<vmem>>, vector<1x2x16x16xf32>
          %99 = vector.shape_cast %98 : vector<1x2x16x16xf32> to vector<2x16x16xf32>
          %c0_81 = arith.constant 0 : index
          %c14 = arith.constant 14 : index
          %c0_82 = arith.constant 0 : index
          %c0_83 = arith.constant 0 : index
          %100 = vector.load %arg3[%c0_81, %c14, %c0_82, %c0_83] : memref<1x18x1x1xf32, #tpu.memory_space<vmem>>, vector<1x2x1x1xf32>
          %101 = vector.shape_cast %100 : vector<1x2x1x1xf32> to vector<2x1x1xf32>
          %102 = vector.broadcast %101 : vector<2x1x1xf32> to vector<2x16x16xf32>
          %103 = arith.mulf %99, %102 : vector<2x16x16xf32>
          %104 = arith.addf %97, %103 : vector<2x16x16xf32>
          %c0_84 = arith.constant 0 : index
          %c0_85 = arith.constant 0 : index
          %c9_86 = arith.constant 9 : index
          %c9_87 = arith.constant 9 : index
          %105 = vector.load %arg2[%c0_84, %c0_85, %c9_86, %c9_87] : memref<1x2x30x30xf32, #tpu.memory_space<vmem>>, vector<1x2x16x16xf32>
          %106 = vector.shape_cast %105 : vector<1x2x16x16xf32> to vector<2x16x16xf32>
          %c0_88 = arith.constant 0 : index
          %c16 = arith.constant 16 : index
          %c0_89 = arith.constant 0 : index
          %c0_90 = arith.constant 0 : index
          %107 = vector.load %arg3[%c0_88, %c16, %c0_89, %c0_90] : memref<1x18x1x1xf32, #tpu.memory_space<vmem>>, vector<1x2x1x1xf32>
          %108 = vector.shape_cast %107 : vector<1x2x1x1xf32> to vector<2x1x1xf32>
          %109 = vector.broadcast %108 : vector<2x1x1xf32> to vector<2x16x16xf32>
          %110 = arith.mulf %106, %109 : vector<2x16x16xf32>
          %111 = arith.addf %104, %110 : vector<2x16x16xf32>
          scf.yield %111 : vector<2x16x16xf32>
        }
        scf.yield %47 : vector<2x16x16xf32>
      } else {
        %cst_27 = arith.constant 0.000000e+00 : f32
        %45 = vector.broadcast %cst_27 : f32 to vector<2x16x16xf32>
        %c0_28 = arith.constant 0 : index
        %c0_29 = arith.constant 0 : index
        %c2 = arith.constant 2 : index
        %c2_30 = arith.constant 2 : index
        %46 = vector.load %arg2[%c0_28, %c0_29, %c2, %c2_30] : memref<1x2x30x30xf32, #tpu.memory_space<vmem>>, vector<1x2x16x16xf32>
        %47 = vector.shape_cast %46 : vector<1x2x16x16xf32> to vector<2x16x16xf32>
        %c0_31 = arith.constant 0 : index
        %c0_32 = arith.constant 0 : index
        %c0_33 = arith.constant 0 : index
        %c0_34 = arith.constant 0 : index
        %48 = vector.load %arg3[%c0_31, %c0_32, %c0_33, %c0_34] : memref<1x18x1x1xf32, #tpu.memory_space<vmem>>, vector<1x2x1x1xf32>
        %49 = vector.shape_cast %48 : vector<1x2x1x1xf32> to vector<2x1x1xf32>
        %50 = vector.broadcast %49 : vector<2x1x1xf32> to vector<2x16x16xf32>
        %51 = arith.mulf %47, %50 : vector<2x16x16xf32>
        %52 = arith.addf %45, %51 : vector<2x16x16xf32>
        %c0_35 = arith.constant 0 : index
        %c0_36 = arith.constant 0 : index
        %c2_37 = arith.constant 2 : index
        %c7 = arith.constant 7 : index
        %53 = vector.load %arg2[%c0_35, %c0_36, %c2_37, %c7] : memref<1x2x30x30xf32, #tpu.memory_space<vmem>>, vector<1x2x16x16xf32>
        %54 = vector.shape_cast %53 : vector<1x2x16x16xf32> to vector<2x16x16xf32>
        %c0_38 = arith.constant 0 : index
        %c2_39 = arith.constant 2 : index
        %c0_40 = arith.constant 0 : index
        %c0_41 = arith.constant 0 : index
        %55 = vector.load %arg3[%c0_38, %c2_39, %c0_40, %c0_41] : memref<1x18x1x1xf32, #tpu.memory_space<vmem>>, vector<1x2x1x1xf32>
        %56 = vector.shape_cast %55 : vector<1x2x1x1xf32> to vector<2x1x1xf32>
        %57 = vector.broadcast %56 : vector<2x1x1xf32> to vector<2x16x16xf32>
        %58 = arith.mulf %54, %57 : vector<2x16x16xf32>
        %59 = arith.addf %52, %58 : vector<2x16x16xf32>
        %c0_42 = arith.constant 0 : index
        %c0_43 = arith.constant 0 : index
        %c2_44 = arith.constant 2 : index
        %c12 = arith.constant 12 : index
        %60 = vector.load %arg2[%c0_42, %c0_43, %c2_44, %c12] : memref<1x2x30x30xf32, #tpu.memory_space<vmem>>, vector<1x2x16x16xf32>
        %61 = vector.shape_cast %60 : vector<1x2x16x16xf32> to vector<2x16x16xf32>
        %c0_45 = arith.constant 0 : index
        %c4 = arith.constant 4 : index
        %c0_46 = arith.constant 0 : index
        %c0_47 = arith.constant 0 : index
        %62 = vector.load %arg3[%c0_45, %c4, %c0_46, %c0_47] : memref<1x18x1x1xf32, #tpu.memory_space<vmem>>, vector<1x2x1x1xf32>
        %63 = vector.shape_cast %62 : vector<1x2x1x1xf32> to vector<2x1x1xf32>
        %64 = vector.broadcast %63 : vector<2x1x1xf32> to vector<2x16x16xf32>
        %65 = arith.mulf %61, %64 : vector<2x16x16xf32>
        %66 = arith.addf %59, %65 : vector<2x16x16xf32>
        %c0_48 = arith.constant 0 : index
        %c0_49 = arith.constant 0 : index
        %c7_50 = arith.constant 7 : index
        %c2_51 = arith.constant 2 : index
        %67 = vector.load %arg2[%c0_48, %c0_49, %c7_50, %c2_51] : memref<1x2x30x30xf32, #tpu.memory_space<vmem>>, vector<1x2x16x16xf32>
        %68 = vector.shape_cast %67 : vector<1x2x16x16xf32> to vector<2x16x16xf32>
        %c0_52 = arith.constant 0 : index
        %c6 = arith.constant 6 : index
        %c0_53 = arith.constant 0 : index
        %c0_54 = arith.constant 0 : index
        %69 = vector.load %arg3[%c0_52, %c6, %c0_53, %c0_54] : memref<1x18x1x1xf32, #tpu.memory_space<vmem>>, vector<1x2x1x1xf32>
        %70 = vector.shape_cast %69 : vector<1x2x1x1xf32> to vector<2x1x1xf32>
        %71 = vector.broadcast %70 : vector<2x1x1xf32> to vector<2x16x16xf32>
        %72 = arith.mulf %68, %71 : vector<2x16x16xf32>
        %73 = arith.addf %66, %72 : vector<2x16x16xf32>
        %c0_55 = arith.constant 0 : index
        %c0_56 = arith.constant 0 : index
        %c7_57 = arith.constant 7 : index
        %c7_58 = arith.constant 7 : index
        %74 = vector.load %arg2[%c0_55, %c0_56, %c7_57, %c7_58] : memref<1x2x30x30xf32, #tpu.memory_space<vmem>>, vector<1x2x16x16xf32>
        %75 = vector.shape_cast %74 : vector<1x2x16x16xf32> to vector<2x16x16xf32>
        %c0_59 = arith.constant 0 : index
        %c8 = arith.constant 8 : index
        %c0_60 = arith.constant 0 : index
        %c0_61 = arith.constant 0 : index
        %76 = vector.load %arg3[%c0_59, %c8, %c0_60, %c0_61] : memref<1x18x1x1xf32, #tpu.memory_space<vmem>>, vector<1x2x1x1xf32>
        %77 = vector.shape_cast %76 : vector<1x2x1x1xf32> to vector<2x1x1xf32>
        %78 = vector.broadcast %77 : vector<2x1x1xf32> to vector<2x16x16xf32>
        %79 = arith.mulf %75, %78 : vector<2x16x16xf32>
        %80 = arith.addf %73, %79 : vector<2x16x16xf32>
        %c0_62 = arith.constant 0 : index
        %c0_63 = arith.constant 0 : index
        %c7_64 = arith.constant 7 : index
        %c12_65 = arith.constant 12 : index
        %81 = vector.load %arg2[%c0_62, %c0_63, %c7_64, %c12_65] : memref<1x2x30x30xf32, #tpu.memory_space<vmem>>, vector<1x2x16x16xf32>
        %82 = vector.shape_cast %81 : vector<1x2x16x16xf32> to vector<2x16x16xf32>
        %c0_66 = arith.constant 0 : index
        %c10 = arith.constant 10 : index
        %c0_67 = arith.constant 0 : index
        %c0_68 = arith.constant 0 : index
        %83 = vector.load %arg3[%c0_66, %c10, %c0_67, %c0_68] : memref<1x18x1x1xf32, #tpu.memory_space<vmem>>, vector<1x2x1x1xf32>
        %84 = vector.shape_cast %83 : vector<1x2x1x1xf32> to vector<2x1x1xf32>
        %85 = vector.broadcast %84 : vector<2x1x1xf32> to vector<2x16x16xf32>
        %86 = arith.mulf %82, %85 : vector<2x16x16xf32>
        %87 = arith.addf %80, %86 : vector<2x16x16xf32>
        %c0_69 = arith.constant 0 : index
        %c0_70 = arith.constant 0 : index
        %c12_71 = arith.constant 12 : index
        %c2_72 = arith.constant 2 : index
        %88 = vector.load %arg2[%c0_69, %c0_70, %c12_71, %c2_72] : memref<1x2x30x30xf32, #tpu.memory_space<vmem>>, vector<1x2x16x16xf32>
        %89 = vector.shape_cast %88 : vector<1x2x16x16xf32> to vector<2x16x16xf32>
        %c0_73 = arith.constant 0 : index
        %c12_74 = arith.constant 12 : index
        %c0_75 = arith.constant 0 : index
        %c0_76 = arith.constant 0 : index
        %90 = vector.load %arg3[%c0_73, %c12_74, %c0_75, %c0_76] : memref<1x18x1x1xf32, #tpu.memory_space<vmem>>, vector<1x2x1x1xf32>
        %91 = vector.shape_cast %90 : vector<1x2x1x1xf32> to vector<2x1x1xf32>
        %92 = vector.broadcast %91 : vector<2x1x1xf32> to vector<2x16x16xf32>
        %93 = arith.mulf %89, %92 : vector<2x16x16xf32>
        %94 = arith.addf %87, %93 : vector<2x16x16xf32>
        %c0_77 = arith.constant 0 : index
        %c0_78 = arith.constant 0 : index
        %c12_79 = arith.constant 12 : index
        %c7_80 = arith.constant 7 : index
        %95 = vector.load %arg2[%c0_77, %c0_78, %c12_79, %c7_80] : memref<1x2x30x30xf32, #tpu.memory_space<vmem>>, vector<1x2x16x16xf32>
        %96 = vector.shape_cast %95 : vector<1x2x16x16xf32> to vector<2x16x16xf32>
        %c0_81 = arith.constant 0 : index
        %c14 = arith.constant 14 : index
        %c0_82 = arith.constant 0 : index
        %c0_83 = arith.constant 0 : index
        %97 = vector.load %arg3[%c0_81, %c14, %c0_82, %c0_83] : memref<1x18x1x1xf32, #tpu.memory_space<vmem>>, vector<1x2x1x1xf32>
        %98 = vector.shape_cast %97 : vector<1x2x1x1xf32> to vector<2x1x1xf32>
        %99 = vector.broadcast %98 : vector<2x1x1xf32> to vector<2x16x16xf32>
        %100 = arith.mulf %96, %99 : vector<2x16x16xf32>
        %101 = arith.addf %94, %100 : vector<2x16x16xf32>
        %c0_84 = arith.constant 0 : index
        %c0_85 = arith.constant 0 : index
        %c12_86 = arith.constant 12 : index
        %c12_87 = arith.constant 12 : index
        %102 = vector.load %arg2[%c0_84, %c0_85, %c12_86, %c12_87] : memref<1x2x30x30xf32, #tpu.memory_space<vmem>>, vector<1x2x16x16xf32>
        %103 = vector.shape_cast %102 : vector<1x2x16x16xf32> to vector<2x16x16xf32>
        %c0_88 = arith.constant 0 : index
        %c16 = arith.constant 16 : index
        %c0_89 = arith.constant 0 : index
        %c0_90 = arith.constant 0 : index
        %104 = vector.load %arg3[%c0_88, %c16, %c0_89, %c0_90] : memref<1x18x1x1xf32, #tpu.memory_space<vmem>>, vector<1x2x1x1xf32>
        %105 = vector.shape_cast %104 : vector<1x2x1x1xf32> to vector<2x1x1xf32>
        %106 = vector.broadcast %105 : vector<2x1x1xf32> to vector<2x16x16xf32>
        %107 = arith.mulf %103, %106 : vector<2x16x16xf32>
        %108 = arith.addf %101, %107 : vector<2x16x16xf32>
        scf.yield %108 : vector<2x16x16xf32>
      }
      scf.yield %44 : vector<2x16x16xf32>
    } else {
      %cst_26 = arith.constant 0.000000e+00 : f32
      %42 = vector.broadcast %cst_26 : f32 to vector<2x16x16xf32>
      %c0_27 = arith.constant 0 : index
      %c0_28 = arith.constant 0 : index
      %c0_29 = arith.constant 0 : index
      %c0_30 = arith.constant 0 : index
      %43 = vector.load %arg2[%c0_27, %c0_28, %c0_29, %c0_30] : memref<1x2x30x30xf32, #tpu.memory_space<vmem>>, vector<1x2x16x16xf32>
      %44 = vector.shape_cast %43 : vector<1x2x16x16xf32> to vector<2x16x16xf32>
      %c0_31 = arith.constant 0 : index
      %c0_32 = arith.constant 0 : index
      %c0_33 = arith.constant 0 : index
      %c0_34 = arith.constant 0 : index
      %45 = vector.load %arg3[%c0_31, %c0_32, %c0_33, %c0_34] : memref<1x18x1x1xf32, #tpu.memory_space<vmem>>, vector<1x2x1x1xf32>
      %46 = vector.shape_cast %45 : vector<1x2x1x1xf32> to vector<2x1x1xf32>
      %47 = vector.broadcast %46 : vector<2x1x1xf32> to vector<2x16x16xf32>
      %48 = arith.mulf %44, %47 : vector<2x16x16xf32>
      %49 = arith.addf %42, %48 : vector<2x16x16xf32>
      %c0_35 = arith.constant 0 : index
      %c0_36 = arith.constant 0 : index
      %c0_37 = arith.constant 0 : index
      %c7 = arith.constant 7 : index
      %50 = vector.load %arg2[%c0_35, %c0_36, %c0_37, %c7] : memref<1x2x30x30xf32, #tpu.memory_space<vmem>>, vector<1x2x16x16xf32>
      %51 = vector.shape_cast %50 : vector<1x2x16x16xf32> to vector<2x16x16xf32>
      %c0_38 = arith.constant 0 : index
      %c2 = arith.constant 2 : index
      %c0_39 = arith.constant 0 : index
      %c0_40 = arith.constant 0 : index
      %52 = vector.load %arg3[%c0_38, %c2, %c0_39, %c0_40] : memref<1x18x1x1xf32, #tpu.memory_space<vmem>>, vector<1x2x1x1xf32>
      %53 = vector.shape_cast %52 : vector<1x2x1x1xf32> to vector<2x1x1xf32>
      %54 = vector.broadcast %53 : vector<2x1x1xf32> to vector<2x16x16xf32>
      %55 = arith.mulf %51, %54 : vector<2x16x16xf32>
      %56 = arith.addf %49, %55 : vector<2x16x16xf32>
      %c0_41 = arith.constant 0 : index
      %c0_42 = arith.constant 0 : index
      %c0_43 = arith.constant 0 : index
      %c14 = arith.constant 14 : index
      %57 = vector.load %arg2[%c0_41, %c0_42, %c0_43, %c14] : memref<1x2x30x30xf32, #tpu.memory_space<vmem>>, vector<1x2x16x16xf32>
      %58 = vector.shape_cast %57 : vector<1x2x16x16xf32> to vector<2x16x16xf32>
      %c0_44 = arith.constant 0 : index
      %c4 = arith.constant 4 : index
      %c0_45 = arith.constant 0 : index
      %c0_46 = arith.constant 0 : index
      %59 = vector.load %arg3[%c0_44, %c4, %c0_45, %c0_46] : memref<1x18x1x1xf32, #tpu.memory_space<vmem>>, vector<1x2x1x1xf32>
      %60 = vector.shape_cast %59 : vector<1x2x1x1xf32> to vector<2x1x1xf32>
      %61 = vector.broadcast %60 : vector<2x1x1xf32> to vector<2x16x16xf32>
      %62 = arith.mulf %58, %61 : vector<2x16x16xf32>
      %63 = arith.addf %56, %62 : vector<2x16x16xf32>
      %c0_47 = arith.constant 0 : index
      %c0_48 = arith.constant 0 : index
      %c7_49 = arith.constant 7 : index
      %c0_50 = arith.constant 0 : index
      %64 = vector.load %arg2[%c0_47, %c0_48, %c7_49, %c0_50] : memref<1x2x30x30xf32, #tpu.memory_space<vmem>>, vector<1x2x16x16xf32>
      %65 = vector.shape_cast %64 : vector<1x2x16x16xf32> to vector<2x16x16xf32>
      %c0_51 = arith.constant 0 : index
      %c6 = arith.constant 6 : index
      %c0_52 = arith.constant 0 : index
      %c0_53 = arith.constant 0 : index
      %66 = vector.load %arg3[%c0_51, %c6, %c0_52, %c0_53] : memref<1x18x1x1xf32, #tpu.memory_space<vmem>>, vector<1x2x1x1xf32>
      %67 = vector.shape_cast %66 : vector<1x2x1x1xf32> to vector<2x1x1xf32>
      %68 = vector.broadcast %67 : vector<2x1x1xf32> to vector<2x16x16xf32>
      %69 = arith.mulf %65, %68 : vector<2x16x16xf32>
      %70 = arith.addf %63, %69 : vector<2x16x16xf32>
      %c0_54 = arith.constant 0 : index
      %c0_55 = arith.constant 0 : index
      %c7_56 = arith.constant 7 : index
      %c7_57 = arith.constant 7 : index
      %71 = vector.load %arg2[%c0_54, %c0_55, %c7_56, %c7_57] : memref<1x2x30x30xf32, #tpu.memory_space<vmem>>, vector<1x2x16x16xf32>
      %72 = vector.shape_cast %71 : vector<1x2x16x16xf32> to vector<2x16x16xf32>
      %c0_58 = arith.constant 0 : index
      %c8 = arith.constant 8 : index
      %c0_59 = arith.constant 0 : index
      %c0_60 = arith.constant 0 : index
      %73 = vector.load %arg3[%c0_58, %c8, %c0_59, %c0_60] : memref<1x18x1x1xf32, #tpu.memory_space<vmem>>, vector<1x2x1x1xf32>
      %74 = vector.shape_cast %73 : vector<1x2x1x1xf32> to vector<2x1x1xf32>
      %75 = vector.broadcast %74 : vector<2x1x1xf32> to vector<2x16x16xf32>
      %76 = arith.mulf %72, %75 : vector<2x16x16xf32>
      %77 = arith.addf %70, %76 : vector<2x16x16xf32>
      %c0_61 = arith.constant 0 : index
      %c0_62 = arith.constant 0 : index
      %c7_63 = arith.constant 7 : index
      %c14_64 = arith.constant 14 : index
      %78 = vector.load %arg2[%c0_61, %c0_62, %c7_63, %c14_64] : memref<1x2x30x30xf32, #tpu.memory_space<vmem>>, vector<1x2x16x16xf32>
      %79 = vector.shape_cast %78 : vector<1x2x16x16xf32> to vector<2x16x16xf32>
      %c0_65 = arith.constant 0 : index
      %c10 = arith.constant 10 : index
      %c0_66 = arith.constant 0 : index
      %c0_67 = arith.constant 0 : index
      %80 = vector.load %arg3[%c0_65, %c10, %c0_66, %c0_67] : memref<1x18x1x1xf32, #tpu.memory_space<vmem>>, vector<1x2x1x1xf32>
      %81 = vector.shape_cast %80 : vector<1x2x1x1xf32> to vector<2x1x1xf32>
      %82 = vector.broadcast %81 : vector<2x1x1xf32> to vector<2x16x16xf32>
      %83 = arith.mulf %79, %82 : vector<2x16x16xf32>
      %84 = arith.addf %77, %83 : vector<2x16x16xf32>
      %c0_68 = arith.constant 0 : index
      %c0_69 = arith.constant 0 : index
      %c14_70 = arith.constant 14 : index
      %c0_71 = arith.constant 0 : index
      %85 = vector.load %arg2[%c0_68, %c0_69, %c14_70, %c0_71] : memref<1x2x30x30xf32, #tpu.memory_space<vmem>>, vector<1x2x16x16xf32>
      %86 = vector.shape_cast %85 : vector<1x2x16x16xf32> to vector<2x16x16xf32>
      %c0_72 = arith.constant 0 : index
      %c12 = arith.constant 12 : index
      %c0_73 = arith.constant 0 : index
      %c0_74 = arith.constant 0 : index
      %87 = vector.load %arg3[%c0_72, %c12, %c0_73, %c0_74] : memref<1x18x1x1xf32, #tpu.memory_space<vmem>>, vector<1x2x1x1xf32>
      %88 = vector.shape_cast %87 : vector<1x2x1x1xf32> to vector<2x1x1xf32>
      %89 = vector.broadcast %88 : vector<2x1x1xf32> to vector<2x16x16xf32>
      %90 = arith.mulf %86, %89 : vector<2x16x16xf32>
      %91 = arith.addf %84, %90 : vector<2x16x16xf32>
      %c0_75 = arith.constant 0 : index
      %c0_76 = arith.constant 0 : index
      %c14_77 = arith.constant 14 : index
      %c7_78 = arith.constant 7 : index
      %92 = vector.load %arg2[%c0_75, %c0_76, %c14_77, %c7_78] : memref<1x2x30x30xf32, #tpu.memory_space<vmem>>, vector<1x2x16x16xf32>
      %93 = vector.shape_cast %92 : vector<1x2x16x16xf32> to vector<2x16x16xf32>
      %c0_79 = arith.constant 0 : index
      %c14_80 = arith.constant 14 : index
      %c0_81 = arith.constant 0 : index
      %c0_82 = arith.constant 0 : index
      %94 = vector.load %arg3[%c0_79, %c14_80, %c0_81, %c0_82] : memref<1x18x1x1xf32, #tpu.memory_space<vmem>>, vector<1x2x1x1xf32>
      %95 = vector.shape_cast %94 : vector<1x2x1x1xf32> to vector<2x1x1xf32>
      %96 = vector.broadcast %95 : vector<2x1x1xf32> to vector<2x16x16xf32>
      %97 = arith.mulf %93, %96 : vector<2x16x16xf32>
      %98 = arith.addf %91, %97 : vector<2x16x16xf32>
      %c0_83 = arith.constant 0 : index
      %c0_84 = arith.constant 0 : index
      %c14_85 = arith.constant 14 : index
      %c14_86 = arith.constant 14 : index
      %99 = vector.load %arg2[%c0_83, %c0_84, %c14_85, %c14_86] : memref<1x2x30x30xf32, #tpu.memory_space<vmem>>, vector<1x2x16x16xf32>
      %100 = vector.shape_cast %99 : vector<1x2x16x16xf32> to vector<2x16x16xf32>
      %c0_87 = arith.constant 0 : index
      %c16 = arith.constant 16 : index
      %c0_88 = arith.constant 0 : index
      %c0_89 = arith.constant 0 : index
      %101 = vector.load %arg3[%c0_87, %c16, %c0_88, %c0_89] : memref<1x18x1x1xf32, #tpu.memory_space<vmem>>, vector<1x2x1x1xf32>
      %102 = vector.shape_cast %101 : vector<1x2x1x1xf32> to vector<2x1x1xf32>
      %103 = vector.broadcast %102 : vector<2x1x1xf32> to vector<2x16x16xf32>
      %104 = arith.mulf %100, %103 : vector<2x16x16xf32>
      %105 = arith.addf %98, %104 : vector<2x16x16xf32>
      scf.yield %105 : vector<2x16x16xf32>
    }
    %c0 = arith.constant 0 : index
    %c0_1 = arith.constant 0 : index
    %c0_2 = arith.constant 0 : index
    %c0_3 = arith.constant 0 : index
    %4 = vector.load %arg4[%c0, %c0_1, %c0_2, %c0_3] : memref<1x2x1x1xf32, #tpu.memory_space<vmem>>, vector<1x2x1x1xf32>
    %5 = vector.shape_cast %4 : vector<1x2x1x1xf32> to vector<2x1x1xf32>
    %6 = vector.broadcast %5 : vector<2x1x1xf32> to vector<2x16x16xf32>
    %7 = arith.addf %3, %6 : vector<2x16x16xf32>
    %8 = vector.shape_cast %7 : vector<2x16x16xf32> to vector<1x2x16x16xf32>
    %cst = arith.constant dense<0.000000e+00> : vector<1xf32>
    %9 = vector.multi_reduction <add>, %8, %cst [1, 2, 3] : vector<1x2x16x16xf32> to vector<1xf32>
    %10 = vector.shape_cast %9 : vector<1xf32> to vector<1x1x1x1xf32>
    %11 = vector.extract %10[0, 0, 0, 0] : f32 from vector<1x1x1x1xf32>
    %cst_4 = arith.constant 5.120000e+02 : f32
    %12 = arith.divf %11, %cst_4 : f32
    %13 = vector.broadcast %12 : f32 to vector<2x16x16xf32>
    %14 = arith.subf %7, %13 : vector<2x16x16xf32>
    %15 = arith.mulf %14, %14 : vector<2x16x16xf32>
    %16 = vector.shape_cast %15 : vector<2x16x16xf32> to vector<1x2x16x16xf32>
    %cst_5 = arith.constant dense<0.000000e+00> : vector<1xf32>
    %17 = vector.multi_reduction <add>, %16, %cst_5 [1, 2, 3] : vector<1x2x16x16xf32> to vector<1xf32>
    %18 = vector.shape_cast %17 : vector<1xf32> to vector<1x1x1x1xf32>
    %19 = vector.extract %18[0, 0, 0, 0] : f32 from vector<1x1x1x1xf32>
    %cst_6 = arith.constant 5.120000e+02 : f32
    %20 = arith.divf %19, %cst_6 : f32
    %cst_7 = arith.constant 9.99999974E-6 : f32
    %21 = arith.addf %20, %cst_7 : f32
    %22 = math.rsqrt %21 : f32
    %23 = vector.broadcast %22 : f32 to vector<2x16x16xf32>
    %24 = arith.mulf %14, %23 : vector<2x16x16xf32>
    %c0_8 = arith.constant 0 : index
    %c0_9 = arith.constant 0 : index
    %c0_10 = arith.constant 0 : index
    %c0_11 = arith.constant 0 : index
    %25 = vector.load %arg5[%c0_8, %c0_9, %c0_10, %c0_11] : memref<1x2x1x1xf32, #tpu.memory_space<vmem>>, vector<1x2x1x1xf32>
    %26 = vector.shape_cast %25 : vector<1x2x1x1xf32> to vector<2x1x1xf32>
    %27 = vector.broadcast %26 : vector<2x1x1xf32> to vector<2x16x16xf32>
    %28 = arith.mulf %24, %27 : vector<2x16x16xf32>
    %c0_12 = arith.constant 0 : index
    %c0_13 = arith.constant 0 : index
    %c0_14 = arith.constant 0 : index
    %c0_15 = arith.constant 0 : index
    %29 = vector.load %arg6[%c0_12, %c0_13, %c0_14, %c0_15] : memref<1x2x1x1xf32, #tpu.memory_space<vmem>>, vector<1x2x1x1xf32>
    %30 = vector.shape_cast %29 : vector<1x2x1x1xf32> to vector<2x1x1xf32>
    %31 = vector.broadcast %30 : vector<2x1x1xf32> to vector<2x16x16xf32>
    %32 = arith.addf %28, %31 : vector<2x16x16xf32>
    %33 = vector.shape_cast %32 : vector<2x16x16xf32> to vector<32x16xf32>
    %c0_16 = arith.constant 0 : index
    %c0_17 = arith.constant 0 : index
    %34 = vector.load %arg8[%c0_16, %c0_17] : memref<16x8xf32, #tpu.memory_space<vmem>>, vector<16x8xf32>
    %cst_18 = arith.constant dense<0.000000e+00> : vector<32x8xf32>
    %35 = tpu.matmul %33, %34, %cst_18 {dimension_numbers = #tpu.dot_dimension_numbers<[1], [0], [0], [1], [0, 0, 1, 1], [], []>} : vector<32x16xf32>, vector<16x8xf32>, vector<32x8xf32> -> vector<32x8xf32>
    %c0_19 = arith.constant 0 : index
    %c0_20 = arith.constant 0 : index
    %36 = vector.load %arg7[%c0_19, %c0_20] : memref<16x32xf32, #tpu.memory_space<vmem>>, vector<16x32xf32>
    %cst_21 = arith.constant dense<0.000000e+00> : vector<16x8xf32>
    %37 = tpu.matmul %36, %35, %cst_21 {dimension_numbers = #tpu.dot_dimension_numbers<[1], [0], [0], [1], [0, 0, 1, 1], [], []>} : vector<16x32xf32>, vector<32x8xf32>, vector<16x8xf32> -> vector<16x8xf32>
    %38 = vector.shape_cast %37 : vector<16x8xf32> to vector<2x8x8xf32>
    %c0_22 = arith.constant 0 : index
    %c0_23 = arith.constant 0 : index
    %c0_24 = arith.constant 0 : index
    %c0_25 = arith.constant 0 : index
    %39 = vector.load %arg9[%c0_22, %c0_23, %c0_24, %c0_25] : memref<2x1x8x8xf32, #tpu.memory_space<vmem>>, vector<2x1x8x8xf32>
    %40 = vector.shape_cast %39 : vector<2x1x8x8xf32> to vector<2x8x8xf32>
    %41 = vector.shape_cast %38 : vector<2x8x8xf32> to vector<2x1x8x8xf32>
    tpu.vector_store %arg9[%c0_22, %c0_23, %c0_24, %c0_25], %41 {strides = array<i32>} : memref<2x1x8x8xf32, #tpu.memory_space<vmem>>, vector<2x1x8x8xf32>,
    return
  }
  func.func @transform_0(%arg0: i32, %arg1: i32) -> (i32, i32, i32, i32) {
    %c0_i32 = arith.constant 0 : i32
    %c0_i32_0 = arith.constant 0 : i32
    %c0_i32_1 = arith.constant 0 : i32
    return %arg0, %arg1, %c0_i32, %c0_i32_0 : i32, i32, i32, i32
  }
  func.func @transform_1(%arg0: i32, %arg1: i32) -> (i32, i32, i32, i32) {
    %c0_i32 = arith.constant 0 : i32
    %c0_i32_0 = arith.constant 0 : i32
    %c0_i32_1 = arith.constant 0 : i32
    %c0_i32_2 = arith.constant 0 : i32
    return %arg1, %c0_i32, %c0_i32_0, %c0_i32_1 : i32, i32, i32, i32
  }
  func.func @transform_2(%arg0: i32, %arg1: i32) -> (i32, i32, i32, i32) {
    %c0_i32 = arith.constant 0 : i32
    %c0_i32_0 = arith.constant 0 : i32
    %c0_i32_1 = arith.constant 0 : i32
    %c0_i32_2 = arith.constant 0 : i32
    return %arg1, %c0_i32, %c0_i32_0, %c0_i32_1 : i32, i32, i32, i32
  }
  func.func @transform_3(%arg0: i32, %arg1: i32) -> (i32, i32, i32, i32) {
    %c0_i32 = arith.constant 0 : i32
    %c0_i32_0 = arith.constant 0 : i32
    %c0_i32_1 = arith.constant 0 : i32
    %c0_i32_2 = arith.constant 0 : i32
    return %arg1, %c0_i32, %c0_i32_0, %c0_i32_1 : i32, i32, i32, i32
  }
  func.func @transform_4(%arg0: i32, %arg1: i32) -> (i32, i32, i32, i32) {
    %c0_i32 = arith.constant 0 : i32
    %c0_i32_0 = arith.constant 0 : i32
    %c0_i32_1 = arith.constant 0 : i32
    %c0_i32_2 = arith.constant 0 : i32
    return %arg1, %c0_i32, %c0_i32_0, %c0_i32_1 : i32, i32, i32, i32
  }
  func.func @transform_5(%arg0: i32, %arg1: i32) -> (i32, i32) {
    %c0_i32 = arith.constant 0 : i32
    %c0_i32_0 = arith.constant 0 : i32
    %c0_i32_1 = arith.constant 0 : i32
    return %c0_i32, %c0_i32_0 : i32, i32
  }
  func.func @transform_6(%arg0: i32, %arg1: i32) -> (i32, i32) {
    %c0_i32 = arith.constant 0 : i32
    %c0_i32_0 = arith.constant 0 : i32
    %c0_i32_1 = arith.constant 0 : i32
    return %c0_i32, %c0_i32_0 : i32, i32
  }
  func.func @transform_7(%arg0: i32, %arg1: i32) -> (i32, i32, i32, i32) {
    %c0_i32 = arith.constant 0 : i32
    %c0_i32_0 = arith.constant 0 : i32
    %c0_i32_1 = arith.constant 0 : i32
    return %arg1, %arg0, %c0_i32, %c0_i32_0 : i32, i32, i32, i32
  }
}

</mosaic_0001>

<bundles_post_ra>
// kernel: tpu_custom_call.1
= control target key start
LH: loop header
LB: loop body
LE: loop exit
PB: predicated region body
PF: predicated region fallthrough
CT: control target
= control target key end

     0   :  { %s4072_s0 = inlined_call_operand.vmem [shape: f32[2,8,30,30], index: 0, kind: input, shape index: {}]   ;;  %s4073_s1 = inlined_call_operand.vmem [shape: f32[4,18,1,1], index: 1, kind: input, shape index: {}]   ;;  %s4074_s2 = inlined_call_operand.vmem [shape: f32[4,2,1,1], index: 2, kind: input, shape index: {}]   ;;  %s4075_s3 = inlined_call_operand.vmem [shape: f32[4,2,1,1], index: 3, kind: input, shape index: {}]   ;;  %s4076_s4 = inlined_call_operand.vmem [shape: f32[4,2,1,1], index: 4, kind: input, shape index: {}]   ;;  %s4077_s5 = inlined_call_operand.vmem [shape: f32[16,32], index: 5, kind: input, shape index: {}]   ;;  %s4078_s6 = inlined_call_operand.vmem [shape: f32[16,8], index: 6, kind: input, shape index: {}]   ;;  %s4079_s7 = inlined_call_operand.hbm [shape: f32[8,2,8,8], index: 7, kind: output, shape index: {}]  }
   0x1   :  { %4087 = sst [smem:[#allocation12_spill]] %s4072_s0 }
   0x2   :  { %12 = vsyncpa [#allocation3], 0 }
   0x3   :  { %14 = vsyncpa [#allocation3 + $0x1], 0  ;;  %s3273_s24 = smov 0   ;;  %s3275_s25 = smov 0  }
   0x4   :  { %s3277_s26 = smov 0   ;;  %s3279_s27 = smov 0  }
   0x5   :  { %s3281_s28 = smov 0   ;;  %s3283_s29 = smov 0  }
   0x6   :  { %s3285_s30 = smov 0   ;;  %s3287_s8 = smov 0  }
   0x7 LB: > { %4088 = sst [smem:[#allocation5_spill]] %s3095_s26  ;;  %s2413_s9 = sadd.s32 4294967295, %s3115_s8   ;;  %s3115_s8 = sphi %s3287_s8, %s20_s8   ;;  %s3111_s30 = sphi %s3285_s30, %s4115_s30   ;;  %s3107_s29 = sphi %s3283_s29, %s4114_s29   ;;  %s3103_s28 = sphi %s3281_s28, %s4113_s28   ;;  %s3099_s27 = sphi %s3279_s27, %s4112_s27   ;;  %s3095_s26 = sphi %s3277_s26, %s4111_s26   ;;  %s3091_s25 = sphi %s3275_s25, %s4117_s25   ;;  %s3087_s24 = sphi %s3273_s24, %s4116_s24  }
   0x8   : > { %4089 = sst [smem:[#allocation6_spill]] %s3107_s29  ;;  %s2414_s10 = sadd.s32 4294967294, %s3115_s8  }
   0x9   : > { %4090 = sst [smem:[#allocation7_spill]] %s3111_s30  ;;  %s29_s11 = sadd.s32 1, %s3107_s29 }
   0xa   : > { %p30_p0 = scmp.ge.s32.totalorder %s29_s11, 4  ;;  %s32_s12 = sadd.s32 1, %s3111_s30 }
   0xb   : > { %p225_p1 = scmp.ne.s32.totalorder %s3095_s26, %s3091_s25  ;;  %p226_p2 = scmp.eq.s32.totalorder %s2413_s9, 7 }
   0xc   : > { %s4119_s11 = smov (%p30_p0, %s29_s11), 0  ;;  %s4121_s12 = smov (!%p30_p0, %s32_s12), %s3111_s30 }
   0xd   : > { %4091 = sst [smem:[#allocation8_spill]] %s4119_s11  ;;  %s210_s13 = ssub.s32 %s3107_s29, %s4119_s11 }
   0xe   : > { %p3324_p3 = por %p226_p2, %p225_p1  ;;  %p34_p4 = scmp.ge.s32.totalorder %s4121_s12, 2 }
   0xf   : > { %p231_p5 = scmp.ne.s32.totalorder %s3091_s25, %s3087_s24  ;;  %p232_p6 = scmp.eq.s32.totalorder %s2414_s10, 7 }
  0x10   : > { %p2417_p7 = scmp.ge.s32.totalorder %s3115_s8, 1  ;;  %s4123_s12 = smov (%p34_p4, %s4121_s12), 0 }
  0x11   : > { %4093 = sst [smem:[#allocation9_spill]] %s4123_s12  ;;  %p3333_p8 = por %p232_p6, %p231_p5 }
  0x12   : > { %p298_p9 = scmp.lt.s32.totalorder %s3115_s8, 9  ;;  %s211_s16 = ssub.s32 %s3111_s30, %s4123_s12 }
  0x13   : > { %s4094_s15 = scalar_select %p3333_p8, 1, 0 }
  0x14   : > { %s215_s17 = sadd.s32 1, %s3095_s26  ;;  %s212_s18 = sor.u32 %s211_s16, %s210_s13 }
  0x15   : > { %4095 = sst [smem:[#allocation10_spill]] %s4094_s15  ;;  %p299_p10 = pnand %p2417_p7, %p298_p9 }
  0x16   : > { %p213_p11 = scmp.eq.s32.totalorder %s212_s18, 0  ;;  %s4084_s20 = sand.u32 (!%p299_p10), 1, %s3091_s25  }
  0x17   : > { %302 = sbr.rel (%p299_p10) target bundleno = 2616 (0xa38), region = 48  ;;  %s2419_s21 = sshll.u32 (!%p299_p10), %s3099_s27, 1 }
  0x18   : > { %s3342_s19 = scalar_select %p213_p11, %s3095_s26, %s215_s17  }
  0x19   : > { %s2418_s22 = sshll.u32 (!%p299_p10), %s4084_s20, 4  ;;  %p352_p12 = scmp.lt.s32.totalorder (!%p299_p10), %s3103_s28, 1 }
  0x1a   : > { %4096 = sst [smem:[#allocation11_spill]] %s3342_s19  ;;  %p354_p13 = scmp.lt.s32.totalorder (!%p299_p10), %s2419_s21, 7 }
  0x1b   : > { %p362_p0 = scmp.lt.s32.totalorder (!%p299_p10), %s3099_s27, 3  ;;  %p379_p1 = scmp.gt.s32.totalorder (!%p299_p10), %s3099_s27, 0 }
  0x1c   : > { %s353_s23 = scalar_select %p352_p12, %s3103_s28, 1  ;;  %v3385_v0 = vmov 0   ;;  %v3387_v1 = vmov 0   ;;  %v3389_v2 = vmov 0   ;;  %v3391_v3 = vmov 0  }
  0x1d   : > { %s4125_s21 = smov (!%p354_p13, %s2419_s21), 7  ;;  %s4097_s0 = sld [smem:[#allocation12_spill]] }
  0x1e   : > { %s2421_s9 = sshll.u32 %s353_s23, 5  ;;  %s2420_s10 = sshll.u32 %s4125_s21, 2 }
  0x1f   : > { %s358_s13 = sadd.s32 %s2421_s9, %s2420_s10  ;;  %s3382_s26 = scalar_lea.vmem [#allocation2], %s2418_s22 }
  0x20   : > { %s2422_s16 = sshll.u32 %s358_s13, 3 }
  0x21   : > { %s363_s11 = scalar_select %p362_p0, %s3099_s27, 3 }
  0x22   : > { %s380_s30 = scalar_select %p379_p1, %s3099_s27, 0 }
  0x23   : > { %s3355_s12 = scalar_lea.vmem %s4097_s0, %s2422_s16  ;;  %s2626_s29 = smul.u32 18, %s363_s11 }
  0x24   : > { %s2423_s19 = sshll.u32 %s363_s11, 1  ;;  %s4127_s30 = smov (!%p362_p0, %s380_s30), 3 }
  0x25   : > { %s3362_s15 = scalar_lea.vmem %s4074_s2, %s2423_s19  ;;  %s3367_s9 = scalar_lea.vmem %s4075_s3, %s2423_s19 }
  0x26   : > { %s3372_s17 = scalar_lea.vmem %s4073_s1, %s2626_s29  ;;  %s3377_s0 = scalar_lea.vmem %s4076_s4, %s2423_s19 }
  0x27   : > { %p383_p2 = scmp.ne.s32.totalorder %s4127_s30, 0  ;;  %p2431_p4 = scmp.eq.s32.totalorder %s4127_s30, 0 }
  0x28   : > { %s2432_s29 = sadd.s32 (!%p2431_p4), 4294967295, %s4127_s30 }
  0x29   : > { %386 = sbr.rel (%p2431_p4) target bundleno = 1280 (0x500), region = 52  ;;  %p3394_p5 = scmp.ne.s32.totalorder (!%p2431_p4), %s2432_s29, 0 }
  0x2a   : > { %p2433_p6 = scmp.eq.s32.totalorder (!%p2431_p4), %s2432_s29, 0 }
  0x2e   : > { %v3398_v4 = vmov 0   ;;  %v3400_v5 = vmov 0   ;;  %v3402_v6 = vmov 0   ;;  %v3404_v7 = vmov 0   ;;  %391 = sbr.rel (%p2433_p6) target bundleno = 870 (0x366), region = 56  ;;  %s2434_s19 = sadd.s32 (!%p2433_p6), 4294967294, %s4127_s30 }
  0x2f   : > { %p3407_p7 = scmp.ne.s32.totalorder (!%p2433_p6), %s2434_s19, 0  ;;  %p2435_p9 = scmp.eq.s32.totalorder (!%p2433_p6), %s2434_s19, 0 }
  0x33   : > { %v3411_v8 = vmov 0   ;;  %v3413_v9 = vmov 0   ;;  %v3415_v10 = vmov 0   ;;  %v3417_v11 = vmov 0   ;;  %396 = sbr.rel (%p2435_p9) target bundleno = 460 (0x1cc), region = 60  ;;  %s3214_s22 = smov (!%p2435_p9), 127  }
  0x34   : > { %s3215_s23 = smov (!%p2435_p9), 126   ;;  %s3216_s21 = smov (!%p2435_p9), 122  }
  0x38   : > { %v2444_v12 = vld [vmem:[%s3372_s17 + $0x4] ss:$0 sm:$0xff]  ;;  %v2440_v13 = vld [vmem:[%s3372_s17 + $0x2] ss:$0 sm:$0xff]  ;;  %v3213_v14 = vmov 0   ;;  %v3438_v31 = vld [vmem:[%s3355_s12 + $0x6] sm:$0xff] }
  0x39   : > { %2916 = vset.pattern.permute.xlu1 %v3213_v14  ;;  %2915 = vset.pattern.permute.xlu0 %v3213_v14  ;;  %v2445_v15 = vld [vmem:[%s3372_s17 + $0x5] ss:$0 sm:$0xff]  ;;  %v2441_v16 = vld [vmem:[%s3372_s17 + $0x3] ss:$0 sm:$0xff]  ;;  %v2453_v17 = vld [vmem:[%s3372_s17 + $0x9] ss:$0 sm:$0xff] }
  0x3a   : > { %488 = vperm.xlu1 %2916, %v2444_v12   ;;  %443 = vperm.xlu0 %2915, %v2440_v13   ;;  %v2452_v18 = vld [vmem:[%s3372_s17 + $0x8] ss:$0 sm:$0xff]  ;;  %v2457_v19 = vld [vmem:[%s3372_s17 + $0xb] ss:$0 sm:$0xff]  ;;  %v2456_v20 = vld [vmem:[%s3372_s17 + $0xa] ss:$0 sm:$0xff] }
  0x3b   : > { %v2465_v21 = vld [vmem:[%s3372_s17 + $0xf] ss:$0 sm:$0xff]  ;;  %v2464_v22 = vld [vmem:[%s3372_s17 + $0xe] ss:$0 sm:$0xff]  ;;  %v2469_v23 = vld [vmem:[%s3372_s17 + $0x11] ss:$0 sm:$0xff] }
  0x3c   : > { %v2468_v24 = vld [vmem:[%s3372_s17 + $0x10] ss:$0 sm:$0xff]  ;;  %v2437_v25 = vld [vmem:[%s3372_s17 + $0x1] ss:$0 sm:$0xff]  ;;  %v2436_v26 = vld [vmem:[%s3372_s17] ss:$0 sm:$0xff] }
  0x3d   : > { %v2449_v27 = vld [vmem:[%s3372_s17 + $0x7] ss:$0 sm:$0xff]  ;;  %v2448_v28 = vld [vmem:[%s3372_s17 + $0x6] ss:$0 sm:$0xff]  ;;  %v2461_v29 = vld [vmem:[%s3372_s17 + $0xd] ss:$0 sm:$0xff] }
  0x3e   : > { %492 = vperm.xlu1 %2916, %v2445_v15   ;;  %447 = vperm.xlu0 %2915, %v2441_v16   ;;  %v2460_v30 = vld [vmem:[%s3372_s17 + $0xc] ss:$0 sm:$0xff]  ;;  %v3441_v32 = vld [vmem:[%s3355_s12 + $0xe] sm:$0xff] }
  0x3f   : > { %v3446_v36 = vld [vmem:[%s3355_s12 + $0x26] sm:$0xff]  ;;  %v3449_v37 = vld [vmem:[%s3355_s12 + $0x2e] sm:$0xff] }
  0x40   : > { %v3464_v47 = vld [vmem:[%s3355_s12 + $0x7] sm:$0xff]  ;;  %v3467_v48 = vld [vmem:[%s3355_s12 + $0xf] sm:$0xff] }
  0x41   : > { %v3474_v52 = vld [vmem:[%s3355_s12 + $0x27] sm:$0xff]  ;;  %v3477_v53 = vld [vmem:[%s3355_s12 + $0x2f] sm:$0xff] }
  0x42   : > { %570 = vperm.xlu1 %2916, %v2453_v17   ;;  %566 = vperm.xlu0 %2915, %v2452_v18   ;;  %v3492_v63 = vld [vmem:[%s3355_s12 + $0x8] sm:$0xff]  ;;  %v3495_v0 = vld [vmem:[%s3355_s12 + $0x10] sm:$0xff] }
  0x43   : > { %v3502_v4 = vld [vmem:[%s3355_s12 + $0x28] sm:$0xff]  ;;  %v3505_v5 = vld [vmem:[%s3355_s12 + $0x30] sm:$0xff] }
  0x46   : > { %615 = vperm.xlu1 %2916, %v2457_v19   ;;  %611 = vperm.xlu0 %2915, %v2456_v20  }
  0x4a   : > { %693 = vperm.xlu1 %2916, %v2465_v21   ;;  %689 = vperm.xlu0 %2915, %v2464_v22  }
  0x4e   : > { %738 = vperm.xlu1 %2916, %v2469_v23   ;;  %734 = vperm.xlu0 %2915, %v2468_v24  }
  0x52   : > { %418 = vperm.xlu1 %2916, %v2437_v25   ;;  %414 = vperm.xlu0 %2915, %v2436_v26  }
  0x56   : > { %541 = vperm.xlu1 %2916, %v2449_v27   ;;  %537 = vperm.xlu0 %2915, %v2448_v28  }
  0x5a   : > { %664 = vperm.xlu1 %2916, %v2461_v29   ;;  %660 = vperm.xlu0 %2915, %v2460_v30  }
  0xb5   : > { %v444_v33 = vpop.permute.xlu0 %443  ;;  %v489_v41 = vpop.permute.xlu1 %488 }
  0xb6   : > { %v450_v34 = vmul.f32 %v444_v33, %v3438_v31  ;;  %v451_v35 = vmul.f32 %v444_v33, %v3441_v32  ;;  %v495_v42 = vmul.f32 %v489_v41, %v3438_v31  ;;  %v496_v43 = vmul.f32 %v489_v41, %v3441_v32 }
  0xb8   : > { %460 = vrot.lane.b32.xlu1 %v451_v35, %s3214_s22  ;;  %458 = vrot.lane.b32.xlu0 %v450_v34, %s3214_s22 }
  0xb9   : > { %v448_v38 = vpop.permute.xlu0 %447  ;;  %v493_v44 = vpop.permute.xlu1 %492 }
  0xba   : > { %v452_v39 = vmul.f32 %v448_v38, %v3446_v36  ;;  %v453_v40 = vmul.f32 %v448_v38, %v3449_v37  ;;  %v497_v45 = vmul.f32 %v493_v44, %v3446_v36  ;;  %v498_v46 = vmul.f32 %v493_v44, %v3449_v37 }
  0xbc   : > { %464 = vrot.lane.b32.xlu1 %v453_v40, %s3214_s22  ;;  %462 = vrot.lane.b32.xlu0 %v452_v39, %s3214_s22 }
  0xbd   : > { %v567_v49 = vpop.permute.xlu0 %566  ;;  %v571_v54 = vpop.permute.xlu1 %570 }
  0xbe   : > { %v573_v50 = vmul.f32 %v567_v49, %v3464_v47  ;;  %v574_v51 = vmul.f32 %v567_v49, %v3467_v48  ;;  %v575_v55 = vmul.f32 %v571_v54, %v3474_v52  ;;  %v576_v56 = vmul.f32 %v571_v54, %v3477_v53 }
  0xc0   : > { %505 = vrot.lane.b32.xlu1 %v496_v43, %s3215_s23  ;;  %503 = vrot.lane.b32.xlu0 %v495_v42, %s3215_s23 }
  0xc1   : > { %v612_v57 = vpop.permute.xlu0 %611  ;;  %v616_v60 = vpop.permute.xlu1 %615 }
  0xc2   : > { %v618_v58 = vmul.f32 %v612_v57, %v3464_v47  ;;  %v619_v59 = vmul.f32 %v612_v57, %v3467_v48  ;;  %v620_v61 = vmul.f32 %v616_v60, %v3474_v52  ;;  %v621_v62 = vmul.f32 %v616_v60, %v3477_v53 }
  0xc4   : > { %509 = vrot.lane.b32.xlu1 %v498_v46, %s3215_s23  ;;  %507 = vrot.lane.b32.xlu0 %v497_v45, %s3215_s23 }
  0xc5   : > { %v690_v1 = vpop.permute.xlu0 %689  ;;  %v694_v6 = vpop.permute.xlu1 %693 }
  0xc6   : > { %v696_v2 = vmul.f32 %v690_v1, %v3492_v63  ;;  %v697_v3 = vmul.f32 %v690_v1, %v3495_v0  ;;  %v698_v7 = vmul.f32 %v694_v6, %v3502_v4  ;;  %v699_v8 = vmul.f32 %v694_v6, %v3505_v5 }
  0xc8   : > { %583 = vrot.lane.b32.xlu1 %v574_v51, %s3214_s22  ;;  %581 = vrot.lane.b32.xlu0 %v573_v50, %s3214_s22 }
  0xc9   : > { %v735_v9 = vpop.permute.xlu0 %734  ;;  %v739_v12 = vpop.permute.xlu1 %738 }
  0xca   : > { %v741_v10 = vmul.f32 %v735_v9, %v3492_v63  ;;  %v742_v11 = vmul.f32 %v735_v9, %v3495_v0  ;;  %v743_v13 = vmul.f32 %v739_v12, %v3502_v4  ;;  %v744_v14 = vmul.f32 %v739_v12, %v3505_v5 }
  0xcc   : > { %587 = vrot.lane.b32.xlu1 %v576_v56, %s3214_s22  ;;  %585 = vrot.lane.b32.xlu0 %v575_v55, %s3214_s22 }
  0xcd   : > { %v419_v15 = vpop.permute.xlu1 %418  ;;  %v415_v16 = vpop.permute.xlu0 %414 }
  0xce   : > { %v421_v25 = vmul.f32 %v415_v16, %v3438_v31  ;;  %v422_v26 = vmul.f32 %v415_v16, %v3441_v32  ;;  %v423_v29 = vmul.f32 %v419_v15, %v3446_v36  ;;  %v424_v30 = vmul.f32 %v419_v15, %v3449_v37 }
  0xd0   : > { %628 = vrot.lane.b32.xlu1 %v619_v59, %s3215_s23  ;;  %626 = vrot.lane.b32.xlu0 %v618_v58, %s3215_s23 }
  0xd1   : > { %v542_v17 = vpop.permute.xlu1 %541  ;;  %v538_v18 = vpop.permute.xlu0 %537 }
  0xd2   : > { %v544_v35 = vmul.f32 %v538_v18, %v3464_v47  ;;  %v545_v38 = vmul.f32 %v538_v18, %v3467_v48  ;;  %v546_v45 = vmul.f32 %v542_v17, %v3474_v52  ;;  %v547_v36 = vmul.f32 %v542_v17, %v3477_v53 }
  0xd4   : > { %632 = vrot.lane.b32.xlu1 %v621_v62, %s3215_s23  ;;  %630 = vrot.lane.b32.xlu0 %v620_v61, %s3215_s23 }
  0xd5   : > { %v665_v19 = vpop.permute.xlu1 %664  ;;  %v661_v20 = vpop.permute.xlu0 %660 }
  0xd6   : > { %v667_v59 = vmul.f32 %v661_v20, %v3492_v63  ;;  %v668_v60 = vmul.f32 %v661_v20, %v3495_v0 }
  0xd8   : > { %706 = vrot.lane.b32.xlu1 %v697_v3, %s3214_s22  ;;  %704 = vrot.lane.b32.xlu0 %v696_v2, %s3214_s22 }
  0xdc   : > { %710 = vrot.lane.b32.xlu1 %v699_v8, %s3214_s22  ;;  %708 = vrot.lane.b32.xlu0 %v698_v7, %s3214_s22  ;;  %v669_v7 = vmul.f32 %v665_v19, %v3502_v4  ;;  %v670_v8 = vmul.f32 %v665_v19, %v3505_v5 }
  0xe0   : > { %751 = vrot.lane.b32.xlu1 %v742_v11, %s3215_s23  ;;  %749 = vrot.lane.b32.xlu0 %v741_v10, %s3215_s23 }
  0xe4   : > { %755 = vrot.lane.b32.xlu1 %v744_v14, %s3215_s23  ;;  %753 = vrot.lane.b32.xlu0 %v743_v13, %s3215_s23 }
 0x12a   : > { %v461_v21 = vpop.permute.xlu1 %460  ;;  %v459_v22 = vpop.permute.xlu0 %458 }
 0x12b   : > { %v471_v27 = vadd.f32 %v461_v21, %v422_v26  ;;  %v470_v28 = vadd.f32 %v459_v22, %v421_v25 }
 0x12e   : > { %v465_v23 = vpop.permute.xlu1 %464  ;;  %v463_v24 = vpop.permute.xlu0 %462 }
 0x12f   : > { %v473_v41 = vadd.f32 %v465_v23, %v424_v30  ;;  %v472_v42 = vadd.f32 %v463_v24, %v423_v29 }
 0x132   : > { %v506_v33 = vpop.permute.xlu1 %505  ;;  %v504_v34 = vpop.permute.xlu0 %503 }
 0x133   : > { %v516_v39 = vadd.f32 %v506_v33, %v471_v27  ;;  %v515_v40 = vadd.f32 %v504_v34, %v470_v28 }
 0x135   : > { %v549_v43 = vadd.f32 %v545_v38, %v516_v39  ;;  %v548_v31 = vadd.f32 %v544_v35, %v515_v40 }
 0x136   : > { %v510_v44 = vpop.permute.xlu1 %509  ;;  %v508_v32 = vpop.permute.xlu0 %507 }
 0x137   : > { %v518_v46 = vadd.f32 %v510_v44, %v473_v41  ;;  %v517_v37 = vadd.f32 %v508_v32, %v472_v42 }
 0x139   : > { %v551_v49 = vadd.f32 %v547_v36, %v518_v46  ;;  %v550_v50 = vadd.f32 %v546_v45, %v517_v37 }
 0x13a   : > { %v584_v51 = vpop.permute.xlu1 %583  ;;  %v582_v47 = vpop.permute.xlu0 %581 }
 0x13b   : > { %v594_v55 = vadd.f32 %v584_v51, %v549_v43  ;;  %v593_v56 = vadd.f32 %v582_v47, %v548_v31 }
 0x13e   : > { %v588_v54 = vpop.permute.xlu1 %587  ;;  %v586_v48 = vpop.permute.xlu0 %585 }
 0x13f   : > { %v596_v62 = vadd.f32 %v588_v54, %v551_v49  ;;  %v595_v53 = vadd.f32 %v586_v48, %v550_v50 }
 0x142   : > { %v629_v57 = vpop.permute.xlu1 %628  ;;  %v627_v58 = vpop.permute.xlu0 %626 }
 0x143   : > { %v639_v61 = vadd.f32 %v629_v57, %v594_v55  ;;  %v638_v52 = vadd.f32 %v627_v58, %v593_v56 }
 0x145   : > { %v672_v1 = vadd.f32 %v668_v60, %v639_v61  ;;  %v671_v2 = vadd.f32 %v667_v59, %v638_v52 }
 0x146   : > { %v633_v3 = vpop.permute.xlu1 %632  ;;  %v631_v6 = vpop.permute.xlu0 %630 }
 0x147   : > { %v641_v9 = vadd.f32 %v633_v3, %v596_v62  ;;  %v640_v10 = vadd.f32 %v631_v6, %v595_v53 }
 0x149   : > { %v674_v11 = vadd.f32 %v670_v8, %v641_v9  ;;  %v673_v12 = vadd.f32 %v669_v7, %v640_v10 }
 0x14a   : > { %v707_v13 = vpop.permute.xlu1 %706  ;;  %v705_v63 = vpop.permute.xlu0 %704 }
 0x14b   : > { %v717_v15 = vadd.f32 %v707_v13, %v672_v1  ;;  %v716_v16 = vadd.f32 %v705_v63, %v671_v2 }
 0x14e   : > { %v711_v14 = vpop.permute.xlu1 %710  ;;  %v709_v0 = vpop.permute.xlu0 %708 }
 0x14f   : > { %v719_v22 = vadd.f32 %v711_v14, %v674_v11  ;;  %v718_v23 = vadd.f32 %v709_v0, %v673_v12 }
 0x152   : > { %v752_v17 = vpop.permute.xlu1 %751  ;;  %v750_v18 = vpop.permute.xlu0 %749 }
 0x153   : > { %v762_v20 = vadd.f32 %v752_v17, %v717_v15  ;;  %v761_v21 = vadd.f32 %v750_v18, %v716_v16 }
 0x155   : > { %771 = vrot.lane.b32.xlu1 %v762_v20, %s3216_s21  ;;  %769 = vrot.lane.b32.xlu0 %v761_v21, %s3216_s21 }
 0x156   : > { %v756_v4 = vpop.permute.xlu1 %755  ;;  %v754_v5 = vpop.permute.xlu0 %753 }
 0x157   : > { %v764_v19 = vadd.f32 %v756_v4, %v719_v22  ;;  %v763_v24 = vadd.f32 %v754_v5, %v718_v23 }
 0x159   : > { %775 = vrot.lane.b32.xlu1 %v764_v19, %s3216_s21  ;;  %773 = vrot.lane.b32.xlu0 %v763_v24, %s3216_s21 }
 0x1c7   : > { %v772_v10 = vpop.permute.xlu1 %771   ;;  %v770_v11 = vpop.permute.xlu0 %769  }
 0x1cb   : > { %v776_v8 = vpop.permute.xlu1 %775   ;;  %v774_v9 = vpop.permute.xlu0 %773  }
 0x1cc PF: > { %787 = sbr.rel (%p3407_p7) target bundleno = 869 (0x365), region = 64  ;;  %s3218_s10 = smov (!%p3407_p7), 126   ;;  %v3131_v11 = vphi %v3417_v11, %v770_v11   ;;  %v3127_v10 = vphi %v3415_v10, %v772_v10   ;;  %v3123_v9 = vphi %v3413_v9, %v774_v9   ;;  %v3119_v8 = vphi %v3411_v8, %v776_v8  }
 0x1cd   : > { %s3219_s13 = smov (!%p3407_p7), 124   ;;  %s3220_s16 = smov (!%p3407_p7), 123  }
 0x1d1   : > { %v2478_v25 = vld [vmem:[%s3372_s17 + $0x4] ss:$0 sm:$0xff]  ;;  %v2474_v26 = vld [vmem:[%s3372_s17 + $0x2] ss:$0 sm:$0xff]  ;;  %v3217_v27 = vmov 0   ;;  %v3574_v36 = vld [vmem:[%s3355_s12 + $0x5] sm:$0xff] }
 0x1d2   : > { %2918 = vset.pattern.permute.xlu1 %v3217_v27  ;;  %2917 = vset.pattern.permute.xlu0 %v3217_v27  ;;  %v2479_v28 = vld [vmem:[%s3372_s17 + $0x5] ss:$0 sm:$0xff]  ;;  %v2475_v29 = vld [vmem:[%s3372_s17 + $0x3] ss:$0 sm:$0xff]  ;;  %v2487_v30 = vld [vmem:[%s3372_s17 + $0x9] ss:$0 sm:$0xff] }
 0x1d3   : > { %879 = vperm.xlu1 %2918, %v2478_v25   ;;  %834 = vperm.xlu0 %2917, %v2474_v26   ;;  %v2486_v33 = vld [vmem:[%s3372_s17 + $0x8] ss:$0 sm:$0xff]  ;;  %v2491_v34 = vld [vmem:[%s3372_s17 + $0xb] ss:$0 sm:$0xff]  ;;  %v2490_v35 = vld [vmem:[%s3372_s17 + $0xa] ss:$0 sm:$0xff] }
 0x1d4   : > { %v2499_v38 = vld [vmem:[%s3372_s17 + $0xf] ss:$0 sm:$0xff]  ;;  %v2498_v39 = vld [vmem:[%s3372_s17 + $0xe] ss:$0 sm:$0xff]  ;;  %v2503_v40 = vld [vmem:[%s3372_s17 + $0x11] ss:$0 sm:$0xff] }
 0x1d5   : > { %v2502_v41 = vld [vmem:[%s3372_s17 + $0x10] ss:$0 sm:$0xff]  ;;  %v2471_v42 = vld [vmem:[%s3372_s17 + $0x1] ss:$0 sm:$0xff]  ;;  %v2470_v43 = vld [vmem:[%s3372_s17] ss:$0 sm:$0xff] }
 0x1d6   : > { %v2483_v31 = vld [vmem:[%s3372_s17 + $0x7] ss:$0 sm:$0xff]  ;;  %v2482_v44 = vld [vmem:[%s3372_s17 + $0x6] ss:$0 sm:$0xff]  ;;  %v2495_v32 = vld [vmem:[%s3372_s17 + $0xd] ss:$0 sm:$0xff] }
 0x1d7   : > { %883 = vperm.xlu1 %2918, %v2479_v28   ;;  %838 = vperm.xlu0 %2917, %v2475_v29   ;;  %v2494_v45 = vld [vmem:[%s3372_s17 + $0xc] ss:$0 sm:$0xff]  ;;  %v3577_v46 = vld [vmem:[%s3355_s12 + $0xd] sm:$0xff] }
 0x1d8   : > { %v3582_v51 = vld [vmem:[%s3355_s12 + $0x25] sm:$0xff]  ;;  %v3585_v47 = vld [vmem:[%s3355_s12 + $0x2d] sm:$0xff] }
 0x1d9   : > { %v3600_v52 = vld [vmem:[%s3355_s12 + $0x7] sm:$0xff]  ;;  %v3603_v62 = vld [vmem:[%s3355_s12 + $0xf] sm:$0xff] }
 0x1da   : > { %v3610_v3 = vld [vmem:[%s3355_s12 + $0x27] sm:$0xff]  ;;  %v3613_v6 = vld [vmem:[%s3355_s12 + $0x2f] sm:$0xff] }
 0x1db   : > { %961 = vperm.xlu1 %2918, %v2487_v30   ;;  %957 = vperm.xlu0 %2917, %v2486_v33   ;;  %v3628_v0 = vld [vmem:[%s3355_s12 + $0x9] sm:$0xff]  ;;  %v3631_v15 = vld [vmem:[%s3355_s12 + $0x11] sm:$0xff] }
 0x1dc   : > { %v3638_v20 = vld [vmem:[%s3355_s12 + $0x29] sm:$0xff]  ;;  %v3641_v21 = vld [vmem:[%s3355_s12 + $0x31] sm:$0xff] }
 0x1df   : > { %1006 = vperm.xlu1 %2918, %v2491_v34   ;;  %1002 = vperm.xlu0 %2917, %v2490_v35  }
 0x1e3   : > { %1084 = vperm.xlu1 %2918, %v2499_v38   ;;  %1080 = vperm.xlu0 %2917, %v2498_v39  }
 0x1e7   : > { %1129 = vperm.xlu1 %2918, %v2503_v40   ;;  %1125 = vperm.xlu0 %2917, %v2502_v41  }
 0x1eb   : > { %809 = vperm.xlu1 %2918, %v2471_v42   ;;  %805 = vperm.xlu0 %2917, %v2470_v43  }
 0x1ef   : > { %932 = vperm.xlu1 %2918, %v2483_v31   ;;  %928 = vperm.xlu0 %2917, %v2482_v44  }
 0x1f3   : > { %1055 = vperm.xlu1 %2918, %v2495_v32   ;;  %1051 = vperm.xlu0 %2917, %v2494_v45  }
 0x24e   : > { %v835_v37 = vpop.permute.xlu0 %834  ;;  %v880_v56 = vpop.permute.xlu1 %879 }
 0x24f   : > { %v841_v49 = vmul.f32 %v835_v37, %v3574_v36  ;;  %v842_v50 = vmul.f32 %v835_v37, %v3577_v46  ;;  %v886_v57 = vmul.f32 %v880_v56, %v3574_v36  ;;  %v887_v58 = vmul.f32 %v880_v56, %v3577_v46 }
 0x251   : > { %851 = vrot.lane.b32.xlu1 %v842_v50, %s3218_s10  ;;  %849 = vrot.lane.b32.xlu0 %v841_v49, %s3218_s10 }
 0x252   : > { %v839_v54 = vpop.permute.xlu0 %838  ;;  %v884_v59 = vpop.permute.xlu1 %883 }
 0x253   : > { %v843_v48 = vmul.f32 %v839_v54, %v3582_v51  ;;  %v844_v55 = vmul.f32 %v839_v54, %v3585_v47  ;;  %v888_v60 = vmul.f32 %v884_v59, %v3582_v51  ;;  %v889_v61 = vmul.f32 %v884_v59, %v3585_v47 }
 0x255   : > { %855 = vrot.lane.b32.xlu1 %v844_v55, %s3218_s10  ;;  %853 = vrot.lane.b32.xlu0 %v843_v48, %s3218_s10 }
 0x256   : > { %v958_v53 = vpop.permute.xlu0 %957  ;;  %v962_v7 = vpop.permute.xlu1 %961 }
 0x257   : > { %v964_v1 = vmul.f32 %v958_v53, %v3600_v52  ;;  %v965_v2 = vmul.f32 %v958_v53, %v3603_v62  ;;  %v966_v8 = vmul.f32 %v962_v7, %v3610_v3  ;;  %v967_v9 = vmul.f32 %v962_v7, %v3613_v6 }
 0x259   : > { %896 = vrot.lane.b32.xlu1 %v887_v58, %s3219_s13  ;;  %894 = vrot.lane.b32.xlu0 %v886_v57, %s3219_s13 }
 0x25a   : > { %v1003_v10 = vpop.permute.xlu0 %1002  ;;  %v1007_v13 = vpop.permute.xlu1 %1006 }
 0x25b   : > { %v1009_v11 = vmul.f32 %v1003_v10, %v3600_v52  ;;  %v1010_v12 = vmul.f32 %v1003_v10, %v3603_v62  ;;  %v1011_v63 = vmul.f32 %v1007_v13, %v3610_v3  ;;  %v1012_v14 = vmul.f32 %v1007_v13, %v3613_v6 }
 0x25d   : > { %900 = vrot.lane.b32.xlu1 %v889_v61, %s3219_s13  ;;  %898 = vrot.lane.b32.xlu0 %v888_v60, %s3219_s13 }
 0x25e   : > { %v1081_v16 = vpop.permute.xlu0 %1080  ;;  %v1085_v22 = vpop.permute.xlu1 %1084 }
 0x25f   : > { %v1087_v17 = vmul.f32 %v1081_v16, %v3628_v0  ;;  %v1088_v18 = vmul.f32 %v1081_v16, %v3631_v15  ;;  %v1089_v23 = vmul.f32 %v1085_v22, %v3638_v20  ;;  %v1090_v4 = vmul.f32 %v1085_v22, %v3641_v21 }
 0x261   : > { %974 = vrot.lane.b32.xlu1 %v965_v2, %s3218_s10  ;;  %972 = vrot.lane.b32.xlu0 %v964_v1, %s3218_s10 }
 0x262   : > { %v1126_v5 = vpop.permute.xlu0 %1125  ;;  %v1130_v25 = vpop.permute.xlu1 %1129 }
 0x263   : > { %v1132_v19 = vmul.f32 %v1126_v5, %v3628_v0  ;;  %v1133_v24 = vmul.f32 %v1126_v5, %v3631_v15  ;;  %v1134_v26 = vmul.f32 %v1130_v25, %v3638_v20  ;;  %v1135_v27 = vmul.f32 %v1130_v25, %v3641_v21 }
 0x265   : > { %978 = vrot.lane.b32.xlu1 %v967_v9, %s3218_s10  ;;  %976 = vrot.lane.b32.xlu0 %v966_v8, %s3218_s10 }
 0x266   : > { %v810_v28 = vpop.permute.xlu1 %809  ;;  %v806_v29 = vpop.permute.xlu0 %805 }
 0x267   : > { %v812_v42 = vmul.f32 %v806_v29, %v3574_v36  ;;  %v813_v43 = vmul.f32 %v806_v29, %v3577_v46  ;;  %v814_v32 = vmul.f32 %v810_v28, %v3582_v51  ;;  %v815_v45 = vmul.f32 %v810_v28, %v3585_v47 }
 0x269   : > { %1019 = vrot.lane.b32.xlu1 %v1010_v12, %s3219_s13  ;;  %1017 = vrot.lane.b32.xlu0 %v1009_v11, %s3219_s13 }
 0x26a   : > { %v933_v30 = vpop.permute.xlu1 %932  ;;  %v929_v33 = vpop.permute.xlu0 %928 }
 0x26b   : > { %v935_v50 = vmul.f32 %v929_v33, %v3600_v52  ;;  %v936_v54 = vmul.f32 %v929_v33, %v3603_v62  ;;  %v937_v60 = vmul.f32 %v933_v30, %v3610_v3  ;;  %v938_v51 = vmul.f32 %v933_v30, %v3613_v6 }
 0x26d   : > { %1023 = vrot.lane.b32.xlu1 %v1012_v14, %s3219_s13  ;;  %1021 = vrot.lane.b32.xlu0 %v1011_v63, %s3219_s13 }
 0x26e   : > { %v1056_v34 = vpop.permute.xlu1 %1055  ;;  %v1052_v35 = vpop.permute.xlu0 %1051 }
 0x26f   : > { %v1058_v12 = vmul.f32 %v1052_v35, %v3628_v0  ;;  %v1059_v13 = vmul.f32 %v1052_v35, %v3631_v15 }
 0x271   : > { %1097 = vrot.lane.b32.xlu1 %v1088_v18, %s3218_s10  ;;  %1095 = vrot.lane.b32.xlu0 %v1087_v17, %s3218_s10 }
 0x275   : > { %1101 = vrot.lane.b32.xlu1 %v1090_v4, %s3218_s10  ;;  %1099 = vrot.lane.b32.xlu0 %v1089_v23, %s3218_s10  ;;  %v1060_v23 = vmul.f32 %v1056_v34, %v3638_v20  ;;  %v1061_v4 = vmul.f32 %v1056_v34, %v3641_v21 }
 0x279   : > { %1142 = vrot.lane.b32.xlu1 %v1133_v24, %s3219_s13  ;;  %1140 = vrot.lane.b32.xlu0 %v1132_v19, %s3219_s13 }
 0x27d   : > { %1146 = vrot.lane.b32.xlu1 %v1135_v27, %s3219_s13  ;;  %1144 = vrot.lane.b32.xlu0 %v1134_v26, %s3219_s13 }
 0x2c3   : > { %v852_v38 = vpop.permute.xlu1 %851  ;;  %v850_v39 = vpop.permute.xlu0 %849 }
 0x2c4   : > { %v862_v31 = vadd.f32 %v852_v38, %v813_v43  ;;  %v861_v44 = vadd.f32 %v850_v39, %v812_v42 }
 0x2c7   : > { %v856_v40 = vpop.permute.xlu1 %855  ;;  %v854_v41 = vpop.permute.xlu0 %853 }
 0x2c8   : > { %v864_v56 = vadd.f32 %v856_v40, %v815_v45  ;;  %v863_v57 = vadd.f32 %v854_v41, %v814_v32 }
 0x2cb   : > { %v897_v37 = vpop.permute.xlu1 %896  ;;  %v895_v49 = vpop.permute.xlu0 %894 }
 0x2cc   : > { %v907_v48 = vadd.f32 %v897_v37, %v862_v31  ;;  %v906_v55 = vadd.f32 %v895_v49, %v861_v44 }
 0x2ce   : > { %v940_v58 = vadd.f32 %v936_v54, %v907_v48  ;;  %v939_v36 = vadd.f32 %v935_v50, %v906_v55 }
 0x2cf   : > { %v901_v59 = vpop.permute.xlu1 %900  ;;  %v899_v46 = vpop.permute.xlu0 %898 }
 0x2d0   : > { %v909_v61 = vadd.f32 %v901_v59, %v864_v56  ;;  %v908_v47 = vadd.f32 %v899_v46, %v863_v57 }
 0x2d2   : > { %v942_v53 = vadd.f32 %v938_v51, %v909_v61  ;;  %v941_v1 = vadd.f32 %v937_v60, %v908_v47 }
 0x2d3   : > { %v975_v2 = vpop.permute.xlu1 %974  ;;  %v973_v52 = vpop.permute.xlu0 %972 }
 0x2d4   : > { %v985_v8 = vadd.f32 %v975_v2, %v940_v58  ;;  %v984_v9 = vadd.f32 %v973_v52, %v939_v36 }
 0x2d7   : > { %v979_v7 = vpop.permute.xlu1 %978  ;;  %v977_v62 = vpop.permute.xlu0 %976 }
 0x2d8   : > { %v987_v14 = vadd.f32 %v979_v7, %v942_v53  ;;  %v986_v6 = vadd.f32 %v977_v62, %v941_v1 }
 0x2db   : > { %v1020_v10 = vpop.permute.xlu1 %1019  ;;  %v1018_v11 = vpop.permute.xlu0 %1017 }
 0x2dc   : > { %v1030_v63 = vadd.f32 %v1020_v10, %v985_v8  ;;  %v1029_v3 = vadd.f32 %v1018_v11, %v984_v9 }
 0x2de   : > { %v1063_v16 = vadd.f32 %v1059_v13, %v1030_v63  ;;  %v1062_v17 = vadd.f32 %v1058_v12, %v1029_v3 }
 0x2df   : > { %v1024_v18 = vpop.permute.xlu1 %1023  ;;  %v1022_v22 = vpop.permute.xlu0 %1021 }
 0x2e0   : > { %v1032_v5 = vadd.f32 %v1024_v18, %v987_v14  ;;  %v1031_v19 = vadd.f32 %v1022_v22, %v986_v6 }
 0x2e2   : > { %v1065_v24 = vadd.f32 %v1061_v4, %v1032_v5  ;;  %v1064_v25 = vadd.f32 %v1060_v23, %v1031_v19 }
 0x2e3   : > { %v1098_v26 = vpop.permute.xlu1 %1097  ;;  %v1096_v0 = vpop.permute.xlu0 %1095 }
 0x2e4   : > { %v1108_v28 = vadd.f32 %v1098_v26, %v1063_v16  ;;  %v1107_v29 = vadd.f32 %v1096_v0, %v1062_v17 }
 0x2e7   : > { %v1102_v27 = vpop.permute.xlu1 %1101  ;;  %v1100_v15 = vpop.permute.xlu0 %1099 }
 0x2e8   : > { %v1110_v39 = vadd.f32 %v1102_v27, %v1065_v24  ;;  %v1109_v40 = vadd.f32 %v1100_v15, %v1064_v25 }
 0x2eb   : > { %v1143_v30 = vpop.permute.xlu1 %1142  ;;  %v1141_v33 = vpop.permute.xlu0 %1140 }
 0x2ec   : > { %v1153_v35 = vadd.f32 %v1143_v30, %v1108_v28  ;;  %v1152_v38 = vadd.f32 %v1141_v33, %v1107_v29 }
 0x2ee   : > { %1162 = vrot.lane.b32.xlu1 %v1153_v35, %s3220_s16  ;;  %1160 = vrot.lane.b32.xlu0 %v1152_v38, %s3220_s16 }
 0x2ef   : > { %v1147_v20 = vpop.permute.xlu1 %1146  ;;  %v1145_v21 = vpop.permute.xlu0 %1144 }
 0x2f0   : > { %v1155_v34 = vadd.f32 %v1147_v20, %v1110_v39  ;;  %v1154_v41 = vadd.f32 %v1145_v21, %v1109_v40 }
 0x2f2   : > { %1166 = vrot.lane.b32.xlu1 %v1155_v34, %s3220_s16  ;;  %1164 = vrot.lane.b32.xlu0 %v1154_v41, %s3220_s16 }
 0x360   : > { %v1163_v10 = vpop.permute.xlu1 %1162   ;;  %v1161_v11 = vpop.permute.xlu0 %1160  }
 0x364   : > { %v1167_v8 = vpop.permute.xlu1 %1166   ;;  %v1165_v9 = vpop.permute.xlu0 %1164  }
 0x365 PF: > { %v4100_v4 = vmov %v3135_v8  ;;  %v4101_v5 = vmov %v3139_v9  ;;  %v4102_v6 = vmov %v3143_v10  ;;  %v4103_v7 = vmov %v3147_v11  ;;  %v3147_v11 = vphi %v3131_v11, %v1161_v11   ;;  %v3143_v10 = vphi %v3127_v10, %v1163_v10   ;;  %v3139_v9 = vphi %v3123_v9, %v1165_v9   ;;  %v3135_v8 = vphi %v3119_v8, %v1167_v8  }
 0x366 PF: > { %1182 = sbr.rel (%p3394_p5) target bundleno = 1279 (0x4ff), region = 68  ;;  %s3222_s18 = smov (!%p3394_p5), 123   ;;  %v3163_v7 = vphi %v3404_v7, %v4103_v7   ;;  %v3159_v6 = vphi %v3402_v6, %v4102_v6   ;;  %v3155_v5 = vphi %v3400_v5, %v4101_v5   ;;  %v3151_v4 = vphi %v3398_v4, %v4100_v4  }
 0x367   : > { %s3223_s29 = smov (!%p3394_p5), 118   ;;  %s3224_s11 = smov (!%p3394_p5), 126  }
 0x36b   : > { %v2512_v42 = vld [vmem:[%s3372_s17 + $0x4] ss:$0 sm:$0xff]  ;;  %v2508_v43 = vld [vmem:[%s3372_s17 + $0x2] ss:$0 sm:$0xff]  ;;  %v3221_v31 = vmov 0   ;;  %v3725_v61 = vld [vmem:[%s3355_s12 + $0xa] sm:$0xff] }
 0x36c   : > { %2920 = vset.pattern.permute.xlu1 %v3221_v31  ;;  %2919 = vset.pattern.permute.xlu0 %v3221_v31  ;;  %v2513_v44 = vld [vmem:[%s3372_s17 + $0x5] ss:$0 sm:$0xff]  ;;  %v2509_v32 = vld [vmem:[%s3372_s17 + $0x3] ss:$0 sm:$0xff]  ;;  %v2521_v45 = vld [vmem:[%s3372_s17 + $0x9] ss:$0 sm:$0xff] }
 0x36d   : > { %1274 = vperm.xlu1 %2920, %v2512_v42   ;;  %1229 = vperm.xlu0 %2919, %v2508_v43   ;;  %v2520_v37 = vld [vmem:[%s3372_s17 + $0x8] ss:$0 sm:$0xff]  ;;  %v2525_v49 = vld [vmem:[%s3372_s17 + $0xb] ss:$0 sm:$0xff]  ;;  %v2524_v50 = vld [vmem:[%s3372_s17 + $0xa] ss:$0 sm:$0xff] }
 0x36e   : > { %v2533_v54 = vld [vmem:[%s3372_s17 + $0xf] ss:$0 sm:$0xff]  ;;  %v2532_v48 = vld [vmem:[%s3372_s17 + $0xe] ss:$0 sm:$0xff]  ;;  %v2537_v55 = vld [vmem:[%s3372_s17 + $0x11] ss:$0 sm:$0xff] }
 0x36f   : > { %v2536_v56 = vld [vmem:[%s3372_s17 + $0x10] ss:$0 sm:$0xff]  ;;  %v2505_v57 = vld [vmem:[%s3372_s17 + $0x1] ss:$0 sm:$0xff]  ;;  %v2504_v58 = vld [vmem:[%s3372_s17] ss:$0 sm:$0xff] }
 0x370   : > { %v2517_v36 = vld [vmem:[%s3372_s17 + $0x7] ss:$0 sm:$0xff]  ;;  %v2516_v59 = vld [vmem:[%s3372_s17 + $0x6] ss:$0 sm:$0xff]  ;;  %v2529_v46 = vld [vmem:[%s3372_s17 + $0xd] ss:$0 sm:$0xff] }
 0x371   : > { %1278 = vperm.xlu1 %2920, %v2513_v44   ;;  %1233 = vperm.xlu0 %2919, %v2509_v32   ;;  %v2528_v60 = vld [vmem:[%s3372_s17 + $0xc] ss:$0 sm:$0xff]  ;;  %v3722_v51 = vld [vmem:[%s3355_s12 + $0x2] sm:$0xff]  ;;  %v3751_v14 = vld [vmem:[%s3355_s12 + $0xf] sm:$0xff] }
 0x372   : > { %v3730_v2 = vld [vmem:[%s3355_s12 + $0x22] sm:$0xff]  ;;  %v3733_v52 = vld [vmem:[%s3355_s12 + $0x2a] sm:$0xff]  ;;  %v3779_v28 = vld [vmem:[%s3355_s12 + $0x14] sm:$0xff] }
 0x373   : > { %v3748_v3 = vld [vmem:[%s3355_s12 + $0x7] sm:$0xff]  ;;  %v3761_v22 = vld [vmem:[%s3355_s12 + $0x2f] sm:$0xff] }
 0x374   : > { %v3758_v18 = vld [vmem:[%s3355_s12 + $0x27] sm:$0xff]  ;;  %v3789_v38 = vld [vmem:[%s3355_s12 + $0x34] sm:$0xff] }
 0x375   : > { %1356 = vperm.xlu1 %2920, %v2521_v45   ;;  %1352 = vperm.xlu0 %2919, %v2520_v37   ;;  %v3776_v15 = vld [vmem:[%s3355_s12 + $0xc] sm:$0xff] }
 0x376   : > { %v3786_v35 = vld [vmem:[%s3355_s12 + $0x2c] sm:$0xff] }
 0x379   : > { %1401 = vperm.xlu1 %2920, %v2525_v49   ;;  %1397 = vperm.xlu0 %2919, %v2524_v50  }
 0x37d   : > { %1479 = vperm.xlu1 %2920, %v2533_v54   ;;  %1475 = vperm.xlu0 %2919, %v2532_v48  }
 0x381   : > { %1524 = vperm.xlu1 %2920, %v2537_v55   ;;  %1520 = vperm.xlu0 %2919, %v2536_v56  }
 0x385   : > { %1204 = vperm.xlu1 %2920, %v2505_v57   ;;  %1200 = vperm.xlu0 %2919, %v2504_v58  }
 0x389   : > { %1327 = vperm.xlu1 %2920, %v2517_v36   ;;  %1323 = vperm.xlu0 %2919, %v2516_v59  }
 0x38d   : > { %1450 = vperm.xlu1 %2920, %v2529_v46   ;;  %1446 = vperm.xlu0 %2919, %v2528_v60  }
 0x3e8   : > { %v1230_v47 = vpop.permute.xlu0 %1229  ;;  %v1275_v9 = vpop.permute.xlu1 %1274 }
 0x3e9   : > { %v1236_v53 = vmul.f32 %v1230_v47, %v3722_v51  ;;  %v1237_v1 = vmul.f32 %v1230_v47, %v3725_v61  ;;  %v1281_v10 = vmul.f32 %v1275_v9, %v3722_v51  ;;  %v1282_v11 = vmul.f32 %v1275_v9, %v3725_v61 }
 0x3eb   : > { %1246 = vrot.lane.b32.xlu1 %v1237_v1, %s3222_s18  ;;  %1244 = vrot.lane.b32.xlu0 %v1236_v53, %s3222_s18 }
 0x3ec   : > { %v1234_v7 = vpop.permute.xlu0 %1233  ;;  %v1279_v12 = vpop.permute.xlu1 %1278 }
 0x3ed   : > { %v1238_v62 = vmul.f32 %v1234_v7, %v3730_v2  ;;  %v1239_v8 = vmul.f32 %v1234_v7, %v3733_v52  ;;  %v1283_v13 = vmul.f32 %v1279_v12, %v3730_v2  ;;  %v1284_v63 = vmul.f32 %v1279_v12, %v3733_v52 }
 0x3ef   : > { %1250 = vrot.lane.b32.xlu1 %v1239_v8, %s3222_s18  ;;  %1248 = vrot.lane.b32.xlu0 %v1238_v62, %s3222_s18 }
 0x3f0   : > { %v1353_v6 = vpop.permute.xlu0 %1352  ;;  %v1357_v23 = vpop.permute.xlu1 %1356 }
 0x3f1   : > { %v1359_v16 = vmul.f32 %v1353_v6, %v3748_v3  ;;  %v1360_v17 = vmul.f32 %v1353_v6, %v3751_v14  ;;  %v1361_v4 = vmul.f32 %v1357_v23, %v3758_v18  ;;  %v1362_v5 = vmul.f32 %v1357_v23, %v3761_v22 }
 0x3f3   : > { %1291 = vrot.lane.b32.xlu1 %v1282_v11, %s3223_s29  ;;  %1289 = vrot.lane.b32.xlu0 %v1281_v10, %s3223_s29 }
 0x3f4   : > { %v1398_v19 = vpop.permute.xlu0 %1397  ;;  %v1402_v26 = vpop.permute.xlu1 %1401 }
 0x3f5   : > { %v1404_v24 = vmul.f32 %v1398_v19, %v3748_v3  ;;  %v1405_v25 = vmul.f32 %v1398_v19, %v3751_v14  ;;  %v1406_v0 = vmul.f32 %v1402_v26, %v3758_v18  ;;  %v1407_v27 = vmul.f32 %v1402_v26, %v3761_v22 }
 0x3f7   : > { %1295 = vrot.lane.b32.xlu1 %v1284_v63, %s3223_s29  ;;  %1293 = vrot.lane.b32.xlu0 %v1283_v13, %s3223_s29 }
 0x3f8   : > { %v1476_v29 = vpop.permute.xlu0 %1475  ;;  %v1480_v39 = vpop.permute.xlu1 %1479 }
 0x3f9   : > { %v1482_v30 = vmul.f32 %v1476_v29, %v3776_v15  ;;  %v1483_v33 = vmul.f32 %v1476_v29, %v3779_v28  ;;  %v1484_v40 = vmul.f32 %v1480_v39, %v3786_v35  ;;  %v1485_v20 = vmul.f32 %v1480_v39, %v3789_v38 }
 0x3fb   : > { %1369 = vrot.lane.b32.xlu1 %v1360_v17, %s3222_s18  ;;  %1367 = vrot.lane.b32.xlu0 %v1359_v16, %s3222_s18 }
 0x3fc   : > { %v1521_v21 = vpop.permute.xlu0 %1520  ;;  %v1525_v42 = vpop.permute.xlu1 %1524 }
 0x3fd   : > { %v1527_v34 = vmul.f32 %v1521_v21, %v3776_v15  ;;  %v1528_v41 = vmul.f32 %v1521_v21, %v3779_v28  ;;  %v1529_v43 = vmul.f32 %v1525_v42, %v3786_v35  ;;  %v1530_v31 = vmul.f32 %v1525_v42, %v3789_v38 }
 0x3ff   : > { %1373 = vrot.lane.b32.xlu1 %v1362_v5, %s3222_s18  ;;  %1371 = vrot.lane.b32.xlu0 %v1361_v4, %s3222_s18 }
 0x400   : > { %v1205_v44 = vpop.permute.xlu1 %1204  ;;  %v1201_v32 = vpop.permute.xlu0 %1200 }
 0x401   : > { %v1207_v57 = vmul.f32 %v1201_v32, %v3722_v51  ;;  %v1208_v58 = vmul.f32 %v1201_v32, %v3725_v61  ;;  %v1209_v46 = vmul.f32 %v1205_v44, %v3730_v2  ;;  %v1210_v60 = vmul.f32 %v1205_v44, %v3733_v52 }
 0x403   : > { %1414 = vrot.lane.b32.xlu1 %v1405_v25, %s3223_s29  ;;  %1412 = vrot.lane.b32.xlu0 %v1404_v24, %s3223_s29 }
 0x404   : > { %v1328_v45 = vpop.permute.xlu1 %1327  ;;  %v1324_v37 = vpop.permute.xlu0 %1323 }
 0x405   : > { %v1330_v1 = vmul.f32 %v1324_v37, %v3748_v3  ;;  %v1331_v7 = vmul.f32 %v1324_v37, %v3751_v14  ;;  %v1332_v13 = vmul.f32 %v1328_v45, %v3758_v18  ;;  %v1333_v2 = vmul.f32 %v1328_v45, %v3761_v22 }
 0x407   : > { %1418 = vrot.lane.b32.xlu1 %v1407_v27, %s3223_s29  ;;  %1416 = vrot.lane.b32.xlu0 %v1406_v0, %s3223_s29 }
 0x408   : > { %v1451_v49 = vpop.permute.xlu1 %1450  ;;  %v1447_v50 = vpop.permute.xlu0 %1446 }
 0x409   : > { %v1453_v25 = vmul.f32 %v1447_v50, %v3776_v15  ;;  %v1454_v26 = vmul.f32 %v1447_v50, %v3779_v28 }
 0x40b   : > { %1492 = vrot.lane.b32.xlu1 %v1483_v33, %s3222_s18  ;;  %1490 = vrot.lane.b32.xlu0 %v1482_v30, %s3222_s18 }
 0x40f   : > { %1496 = vrot.lane.b32.xlu1 %v1485_v20, %s3222_s18  ;;  %1494 = vrot.lane.b32.xlu0 %v1484_v40, %s3222_s18  ;;  %v1455_v40 = vmul.f32 %v1451_v49, %v3786_v35  ;;  %v1456_v20 = vmul.f32 %v1451_v49, %v3789_v38 }
 0x413   : > { %1537 = vrot.lane.b32.xlu1 %v1528_v41, %s3223_s29  ;;  %1535 = vrot.lane.b32.xlu0 %v1527_v34, %s3223_s29 }
 0x417   : > { %1541 = vrot.lane.b32.xlu1 %v1530_v31, %s3223_s29  ;;  %1539 = vrot.lane.b32.xlu0 %v1529_v43, %s3223_s29 }
 0x45d   : > { %v1247_v54 = vpop.permute.xlu1 %1246  ;;  %v1245_v48 = vpop.permute.xlu0 %1244 }
 0x45e   : > { %v1257_v36 = vadd.f32 %v1247_v54, %v1208_v58  ;;  %v1256_v59 = vadd.f32 %v1245_v48, %v1207_v57 }
 0x461   : > { %v1251_v55 = vpop.permute.xlu1 %1250  ;;  %v1249_v56 = vpop.permute.xlu0 %1248 }
 0x462   : > { %v1259_v9 = vadd.f32 %v1251_v55, %v1210_v60  ;;  %v1258_v10 = vadd.f32 %v1249_v56, %v1209_v46 }
 0x465   : > { %v1292_v47 = vpop.permute.xlu1 %1291  ;;  %v1290_v53 = vpop.permute.xlu0 %1289 }
 0x466   : > { %v1302_v62 = vadd.f32 %v1292_v47, %v1257_v36  ;;  %v1301_v8 = vadd.f32 %v1290_v53, %v1256_v59 }
 0x468   : > { %v1335_v11 = vadd.f32 %v1331_v7, %v1302_v62  ;;  %v1334_v51 = vadd.f32 %v1330_v1, %v1301_v8 }
 0x469   : > { %v1296_v12 = vpop.permute.xlu1 %1295  ;;  %v1294_v61 = vpop.permute.xlu0 %1293 }
 0x46a   : > { %v1304_v63 = vadd.f32 %v1296_v12, %v1259_v9  ;;  %v1303_v52 = vadd.f32 %v1294_v61, %v1258_v10 }
 0x46c   : > { %v1337_v6 = vadd.f32 %v1333_v2, %v1304_v63  ;;  %v1336_v16 = vadd.f32 %v1332_v13, %v1303_v52 }
 0x46d   : > { %v1370_v17 = vpop.permute.xlu1 %1369  ;;  %v1368_v3 = vpop.permute.xlu0 %1367 }
 0x46e   : > { %v1380_v4 = vadd.f32 %v1370_v17, %v1335_v11  ;;  %v1379_v5 = vadd.f32 %v1368_v3, %v1334_v51 }
 0x471   : > { %v1374_v23 = vpop.permute.xlu1 %1373  ;;  %v1372_v14 = vpop.permute.xlu0 %1371 }
 0x472   : > { %v1382_v27 = vadd.f32 %v1374_v23, %v1337_v6  ;;  %v1381_v22 = vadd.f32 %v1372_v14, %v1336_v16 }
 0x475   : > { %v1415_v19 = vpop.permute.xlu1 %1414  ;;  %v1413_v24 = vpop.permute.xlu0 %1412 }
 0x476   : > { %v1425_v0 = vadd.f32 %v1415_v19, %v1380_v4  ;;  %v1424_v18 = vadd.f32 %v1413_v24, %v1379_v5 }
 0x478   : > { %v1458_v29 = vadd.f32 %v1454_v26, %v1425_v0  ;;  %v1457_v30 = vadd.f32 %v1453_v25, %v1424_v18 }
 0x479   : > { %v1419_v33 = vpop.permute.xlu1 %1418  ;;  %v1417_v39 = vpop.permute.xlu0 %1416 }
 0x47a   : > { %v1427_v21 = vadd.f32 %v1419_v33, %v1382_v27  ;;  %v1426_v34 = vadd.f32 %v1417_v39, %v1381_v22 }
 0x47c   : > { %v1460_v41 = vadd.f32 %v1456_v20, %v1427_v21  ;;  %v1459_v42 = vadd.f32 %v1455_v40, %v1426_v34 }
 0x47d   : > { %v1493_v43 = vpop.permute.xlu1 %1492  ;;  %v1491_v15 = vpop.permute.xlu0 %1490 }
 0x47e   : > { %v1503_v44 = vadd.f32 %v1493_v43, %v1458_v29  ;;  %v1502_v32 = vadd.f32 %v1491_v15, %v1457_v30 }
 0x481   : > { %v1497_v31 = vpop.permute.xlu1 %1496  ;;  %v1495_v28 = vpop.permute.xlu0 %1494 }
 0x482   : > { %v1505_v48 = vadd.f32 %v1497_v31, %v1460_v41  ;;  %v1504_v55 = vadd.f32 %v1495_v28, %v1459_v42 }
 0x485   : > { %v1538_v45 = vpop.permute.xlu1 %1537  ;;  %v1536_v37 = vpop.permute.xlu0 %1535 }
 0x486   : > { %v1548_v50 = vadd.f32 %v1538_v45, %v1503_v44  ;;  %v1547_v54 = vadd.f32 %v1536_v37, %v1502_v32 }
 0x488   : > { %1557 = vrot.lane.b32.xlu1 %v1548_v50, %s3224_s11  ;;  %1555 = vrot.lane.b32.xlu0 %v1547_v54, %s3224_s11 }
 0x489   : > { %v1542_v35 = vpop.permute.xlu1 %1541  ;;  %v1540_v38 = vpop.permute.xlu0 %1539 }
 0x48a   : > { %v1550_v49 = vadd.f32 %v1542_v35, %v1505_v48  ;;  %v1549_v56 = vadd.f32 %v1540_v38, %v1504_v55 }
 0x48c   : > { %1561 = vrot.lane.b32.xlu1 %v1550_v49, %s3224_s11  ;;  %1559 = vrot.lane.b32.xlu0 %v1549_v56, %s3224_s11 }
 0x4fa   : > { %v1558_v6 = vpop.permute.xlu1 %1557   ;;  %v1556_v7 = vpop.permute.xlu0 %1555  }
 0x4fe   : > { %v1562_v4 = vpop.permute.xlu1 %1561   ;;  %v1560_v5 = vpop.permute.xlu0 %1559  }
 0x4ff PF: > { %v4104_v0 = vmov %v3167_v4  ;;  %v4105_v1 = vmov %v3171_v5  ;;  %v4106_v2 = vmov %v3175_v6  ;;  %v4107_v3 = vmov %v3179_v7  ;;  %v3179_v7 = vphi %v3163_v7, %v1556_v7   ;;  %v3175_v6 = vphi %v3159_v6, %v1558_v6   ;;  %v3171_v5 = vphi %v3155_v5, %v1560_v5   ;;  %v3167_v4 = vphi %v3151_v4, %v1562_v4  }
 0x500 PF: > { %1577 = sbr.rel (%p383_p2) target bundleno = 1573 (0x625), region = 72  ;;  %s3226_s30 = smov (!%p383_p2), 121   ;;  %v3195_v3 = vphi %v3391_v3, %v4107_v3   ;;  %v3191_v2 = vphi %v3389_v2, %v4106_v2   ;;  %v3187_v1 = vphi %v3387_v1, %v4105_v1   ;;  %v3183_v0 = vphi %v3385_v0, %v4104_v0  }
 0x505   : > { %v2546_v57 = vld [vmem:[%s3372_s17 + $0x4] ss:$0 sm:$0xff]  ;;  %v2542_v58 = vld [vmem:[%s3372_s17 + $0x2] ss:$0 sm:$0xff]  ;;  %v3225_v36 = vmov 0   ;;  %v3873_v63 = vld [vmem:[%s3355_s12 + $0x8] sm:$0xff] }
 0x506   : > { %2922 = vset.pattern.permute.xlu1 %v3225_v36  ;;  %2921 = vset.pattern.permute.xlu0 %v3225_v36  ;;  %v2547_v59 = vld [vmem:[%s3372_s17 + $0x5] ss:$0 sm:$0xff]  ;;  %v2543_v46 = vld [vmem:[%s3372_s17 + $0x3] ss:$0 sm:$0xff]  ;;  %v2555_v60 = vld [vmem:[%s3372_s17 + $0x9] ss:$0 sm:$0xff] }
 0x507   : > { %1669 = vperm.xlu1 %2922, %v2546_v57   ;;  %1624 = vperm.xlu0 %2921, %v2542_v58   ;;  %v2554_v47 = vld [vmem:[%s3372_s17 + $0x8] ss:$0 sm:$0xff]  ;;  %v2559_v53 = vld [vmem:[%s3372_s17 + $0xb] ss:$0 sm:$0xff]  ;;  %v2558_v1 = vld [vmem:[%s3372_s17 + $0xa] ss:$0 sm:$0xff] }
 0x508   : > { %v2567_v7 = vld [vmem:[%s3372_s17 + $0xf] ss:$0 sm:$0xff]  ;;  %v2566_v62 = vld [vmem:[%s3372_s17 + $0xe] ss:$0 sm:$0xff]  ;;  %v2571_v8 = vld [vmem:[%s3372_s17 + $0x11] ss:$0 sm:$0xff] }
 0x509   : > { %v2570_v9 = vld [vmem:[%s3372_s17 + $0x10] ss:$0 sm:$0xff]  ;;  %v2539_v10 = vld [vmem:[%s3372_s17 + $0x1] ss:$0 sm:$0xff]  ;;  %v2538_v11 = vld [vmem:[%s3372_s17] ss:$0 sm:$0xff] }
 0x50a   : > { %v2551_v51 = vld [vmem:[%s3372_s17 + $0x7] ss:$0 sm:$0xff]  ;;  %v2550_v12 = vld [vmem:[%s3372_s17 + $0x6] ss:$0 sm:$0xff]  ;;  %v2563_v61 = vld [vmem:[%s3372_s17 + $0xd] ss:$0 sm:$0xff] }
 0x50b   : > { %1673 = vperm.xlu1 %2922, %v2547_v59   ;;  %1628 = vperm.xlu0 %2921, %v2543_v46   ;;  %v2562_v13 = vld [vmem:[%s3372_s17 + $0xc] ss:$0 sm:$0xff]  ;;  %v3870_v2 = vld [vmem:[%s3355_s12] sm:$0xff]  ;;  %s3227_s17 = smov 114   ;;  %v3899_v27 = vld [vmem:[%s3355_s12 + $0xf] sm:$0xff] }
 0x50c   : > { %v3878_v17 = vld [vmem:[%s3355_s12 + $0x20] sm:$0xff]  ;;  %v3881_v3 = vld [vmem:[%s3355_s12 + $0x28] sm:$0xff]  ;;  %v3927_v44 = vld [vmem:[%s3355_s12 + $0x16] sm:$0xff] }
 0x50d   : > { %v3896_v18 = vld [vmem:[%s3355_s12 + $0x7] sm:$0xff]  ;;  %v3909_v39 = vld [vmem:[%s3355_s12 + $0x2f] sm:$0xff] }
 0x50e   : > { %v3906_v33 = vld [vmem:[%s3355_s12 + $0x27] sm:$0xff]  ;;  %v3937_v54 = vld [vmem:[%s3355_s12 + $0x36] sm:$0xff] }
 0x50f   : > { %1751 = vperm.xlu1 %2922, %v2555_v60   ;;  %1747 = vperm.xlu0 %2921, %v2554_v47   ;;  %v3924_v28 = vld [vmem:[%s3355_s12 + $0xe] sm:$0xff] }
 0x510   : > { %v3934_v50 = vld [vmem:[%s3355_s12 + $0x2e] sm:$0xff] }
 0x513   : > { %1796 = vperm.xlu1 %2922, %v2559_v53   ;;  %1792 = vperm.xlu0 %2921, %v2558_v1  }
 0x517   : > { %1874 = vperm.xlu1 %2922, %v2567_v7   ;;  %1870 = vperm.xlu0 %2921, %v2566_v62  }
 0x51b   : > { %1919 = vperm.xlu1 %2922, %v2571_v8   ;;  %1915 = vperm.xlu0 %2921, %v2570_v9  }
 0x51f   : > { %1599 = vperm.xlu1 %2922, %v2539_v10   ;;  %1595 = vperm.xlu0 %2921, %v2538_v11  }
 0x523   : > { %1722 = vperm.xlu1 %2922, %v2551_v51   ;;  %1718 = vperm.xlu0 %2921, %v2550_v12  }
 0x527   : > { %1845 = vperm.xlu1 %2922, %v2563_v61   ;;  %1841 = vperm.xlu0 %2921, %v2562_v13  }
 0x582   : > { %v1625_v52 = vpop.permute.xlu0 %1624  ;;  %v1670_v5 = vpop.permute.xlu1 %1669 }
 0x583   : > { %v1631_v6 = vmul.f32 %v1625_v52, %v3870_v2  ;;  %v1632_v16 = vmul.f32 %v1625_v52, %v3873_v63  ;;  %v1676_v19 = vmul.f32 %v1670_v5, %v3870_v2  ;;  %v1677_v24 = vmul.f32 %v1670_v5, %v3873_v63 }
 0x585   : > { %1641 = vrot.lane.b32.xlu1 %v1632_v16, %s3226_s30  ;;  %1639 = vrot.lane.b32.xlu0 %v1631_v6, %s3226_s30 }
 0x586   : > { %v1629_v23 = vpop.permute.xlu0 %1628  ;;  %v1674_v25 = vpop.permute.xlu1 %1673 }
 0x587   : > { %v1633_v14 = vmul.f32 %v1629_v23, %v3878_v17  ;;  %v1634_v4 = vmul.f32 %v1629_v23, %v3881_v3  ;;  %v1678_v26 = vmul.f32 %v1674_v25, %v3878_v17  ;;  %v1679_v0 = vmul.f32 %v1674_v25, %v3881_v3 }
 0x589   : > { %1645 = vrot.lane.b32.xlu1 %v1634_v4, %s3226_s30  ;;  %1643 = vrot.lane.b32.xlu0 %v1633_v14, %s3226_s30 }
 0x58a   : > { %v1748_v22 = vpop.permute.xlu0 %1747  ;;  %v1752_v40 = vpop.permute.xlu1 %1751 }
 0x58b   : > { %v1754_v29 = vmul.f32 %v1748_v22, %v3896_v18  ;;  %v1755_v30 = vmul.f32 %v1748_v22, %v3899_v27  ;;  %v1756_v20 = vmul.f32 %v1752_v40, %v3906_v33  ;;  %v1757_v21 = vmul.f32 %v1752_v40, %v3909_v39 }
 0x58d   : > { %1686 = vrot.lane.b32.xlu1 %v1677_v24, %s3227_s17  ;;  %1684 = vrot.lane.b32.xlu0 %v1676_v19, %s3227_s17 }
 0x58e   : > { %v1793_v34 = vpop.permute.xlu0 %1792  ;;  %v1797_v43 = vpop.permute.xlu1 %1796 }
 0x58f   : > { %v1799_v41 = vmul.f32 %v1793_v34, %v3896_v18  ;;  %v1800_v42 = vmul.f32 %v1793_v34, %v3899_v27  ;;  %v1801_v15 = vmul.f32 %v1797_v43, %v3906_v33  ;;  %v1802_v31 = vmul.f32 %v1797_v43, %v3909_v39 }
 0x591   : > { %1690 = vrot.lane.b32.xlu1 %v1679_v0, %s3227_s17  ;;  %1688 = vrot.lane.b32.xlu0 %v1678_v26, %s3227_s17 }
 0x592   : > { %v1871_v32 = vpop.permute.xlu0 %1870  ;;  %v1875_v48 = vpop.permute.xlu1 %1874 }
 0x593   : > { %v1877_v45 = vmul.f32 %v1871_v32, %v3924_v28  ;;  %v1878_v37 = vmul.f32 %v1871_v32, %v3927_v44  ;;  %v1879_v55 = vmul.f32 %v1875_v48, %v3934_v50  ;;  %v1880_v35 = vmul.f32 %v1875_v48, %v3937_v54 }
 0x595   : > { %1764 = vrot.lane.b32.xlu1 %v1755_v30, %s3226_s30  ;;  %1762 = vrot.lane.b32.xlu0 %v1754_v29, %s3226_s30 }
 0x596   : > { %v1916_v38 = vpop.permute.xlu0 %1915  ;;  %v1920_v57 = vpop.permute.xlu1 %1919 }
 0x597   : > { %v1922_v49 = vmul.f32 %v1916_v38, %v3924_v28  ;;  %v1923_v56 = vmul.f32 %v1916_v38, %v3927_v44  ;;  %v1924_v58 = vmul.f32 %v1920_v57, %v3934_v50  ;;  %v1925_v36 = vmul.f32 %v1920_v57, %v3937_v54 }
 0x599   : > { %1768 = vrot.lane.b32.xlu1 %v1757_v21, %s3226_s30  ;;  %1766 = vrot.lane.b32.xlu0 %v1756_v20, %s3226_s30 }
 0x59a   : > { %v1600_v59 = vpop.permute.xlu1 %1599  ;;  %v1596_v46 = vpop.permute.xlu0 %1595 }
 0x59b   : > { %v1602_v10 = vmul.f32 %v1596_v46, %v3870_v2  ;;  %v1603_v11 = vmul.f32 %v1596_v46, %v3873_v63  ;;  %v1604_v61 = vmul.f32 %v1600_v59, %v3878_v17  ;;  %v1605_v13 = vmul.f32 %v1600_v59, %v3881_v3 }
 0x59d   : > { %1809 = vrot.lane.b32.xlu1 %v1800_v42, %s3227_s17  ;;  %1807 = vrot.lane.b32.xlu0 %v1799_v41, %s3227_s17 }
 0x59e   : > { %v1723_v60 = vpop.permute.xlu1 %1722  ;;  %v1719_v47 = vpop.permute.xlu0 %1718 }
 0x59f   : > { %v1725_v16 = vmul.f32 %v1719_v47, %v3896_v18  ;;  %v1726_v23 = vmul.f32 %v1719_v47, %v3899_v27  ;;  %v1727_v26 = vmul.f32 %v1723_v60, %v3906_v33  ;;  %v1728_v17 = vmul.f32 %v1723_v60, %v3909_v39 }
 0x5a1   : > { %1813 = vrot.lane.b32.xlu1 %v1802_v31, %s3227_s17  ;;  %1811 = vrot.lane.b32.xlu0 %v1801_v15, %s3227_s17 }
 0x5a2   : > { %v1846_v53 = vpop.permute.xlu1 %1845  ;;  %v1842_v1 = vpop.permute.xlu0 %1841 }
 0x5a3   : > { %v1848_v42 = vmul.f32 %v1842_v1, %v3924_v28  ;;  %v1849_v43 = vmul.f32 %v1842_v1, %v3927_v44 }
 0x5a5   : > { %1887 = vrot.lane.b32.xlu1 %v1878_v37, %s3226_s30  ;;  %1885 = vrot.lane.b32.xlu0 %v1877_v45, %s3226_s30 }
 0x5a9   : > { %1891 = vrot.lane.b32.xlu1 %v1880_v35, %s3226_s30  ;;  %1889 = vrot.lane.b32.xlu0 %v1879_v55, %s3226_s30  ;;  %v1850_v55 = vmul.f32 %v1846_v53, %v3934_v50  ;;  %v1851_v35 = vmul.f32 %v1846_v53, %v3937_v54 }
 0x5ad   : > { %1932 = vrot.lane.b32.xlu1 %v1923_v56, %s3227_s17  ;;  %1930 = vrot.lane.b32.xlu0 %v1922_v49, %s3227_s17 }
 0x5b1   : > { %1936 = vrot.lane.b32.xlu1 %v1925_v36, %s3227_s17  ;;  %1934 = vrot.lane.b32.xlu0 %v1924_v58, %s3227_s17 }
 0x5f7   : > { %v1642_v7 = vpop.permute.xlu1 %1641  ;;  %v1640_v62 = vpop.permute.xlu0 %1639 }
 0x5f8   : > { %v1652_v51 = vadd.f32 %v1642_v7, %v1603_v11  ;;  %v1651_v12 = vadd.f32 %v1640_v62, %v1602_v10 }
 0x5fb   : > { %v1646_v8 = vpop.permute.xlu1 %1645  ;;  %v1644_v9 = vpop.permute.xlu0 %1643 }
 0x5fc   : > { %v1654_v5 = vadd.f32 %v1646_v8, %v1605_v13  ;;  %v1653_v19 = vadd.f32 %v1644_v9, %v1604_v61 }
 0x5ff   : > { %v1687_v52 = vpop.permute.xlu1 %1686  ;;  %v1685_v6 = vpop.permute.xlu0 %1684 }
 0x600   : > { %v1697_v14 = vadd.f32 %v1687_v52, %v1652_v51  ;;  %v1696_v4 = vadd.f32 %v1685_v6, %v1651_v12 }
 0x602   : > { %v1730_v24 = vadd.f32 %v1726_v23, %v1697_v14  ;;  %v1729_v2 = vadd.f32 %v1725_v16, %v1696_v4 }
 0x603   : > { %v1691_v25 = vpop.permute.xlu1 %1690  ;;  %v1689_v63 = vpop.permute.xlu0 %1688 }
 0x604   : > { %v1699_v0 = vadd.f32 %v1691_v25, %v1654_v5  ;;  %v1698_v3 = vadd.f32 %v1689_v63, %v1653_v19 }
 0x606   : > { %v1732_v22 = vadd.f32 %v1728_v17, %v1699_v0  ;;  %v1731_v29 = vadd.f32 %v1727_v26, %v1698_v3 }
 0x607   : > { %v1765_v30 = vpop.permute.xlu1 %1764  ;;  %v1763_v18 = vpop.permute.xlu0 %1762 }
 0x608   : > { %v1775_v20 = vadd.f32 %v1765_v30, %v1730_v24  ;;  %v1774_v21 = vadd.f32 %v1763_v18, %v1729_v2 }
 0x60b   : > { %v1769_v40 = vpop.permute.xlu1 %1768  ;;  %v1767_v27 = vpop.permute.xlu0 %1766 }
 0x60c   : > { %v1777_v31 = vadd.f32 %v1769_v40, %v1732_v22  ;;  %v1776_v39 = vadd.f32 %v1767_v27, %v1731_v29 }
 0x60f   : > { %v1810_v34 = vpop.permute.xlu1 %1809  ;;  %v1808_v41 = vpop.permute.xlu0 %1807 }
 0x610   : > { %v1820_v15 = vadd.f32 %v1810_v34, %v1775_v20  ;;  %v1819_v33 = vadd.f32 %v1808_v41, %v1774_v21 }
 0x612   : > { %v1853_v32 = vadd.f32 %v1849_v43, %v1820_v15  ;;  %v1852_v45 = vadd.f32 %v1848_v42, %v1819_v33 }
 0x613   : > { %v1814_v37 = vpop.permute.xlu1 %1813  ;;  %v1812_v48 = vpop.permute.xlu0 %1811 }
 0x614   : > { %v1822_v38 = vadd.f32 %v1814_v37, %v1777_v31  ;;  %v1821_v49 = vadd.f32 %v1812_v48, %v1776_v39 }
 0x616   : > { %v1855_v56 = vadd.f32 %v1851_v35, %v1822_v38  ;;  %v1854_v57 = vadd.f32 %v1850_v55, %v1821_v49 }
 0x617   : > { %v1888_v58 = vpop.permute.xlu1 %1887  ;;  %v1886_v28 = vpop.permute.xlu0 %1885 }
 0x618   : > { %v1898_v59 = vadd.f32 %v1888_v58, %v1853_v32  ;;  %v1897_v46 = vadd.f32 %v1886_v28, %v1852_v45 }
 0x61b   : > { %v1892_v36 = vpop.permute.xlu1 %1891  ;;  %v1890_v44 = vpop.permute.xlu0 %1889 }
 0x61c   : > { %v1900_v1 = vadd.f32 %v1892_v36, %v1855_v56  ;;  %v1899_v7 = vadd.f32 %v1890_v44, %v1854_v57 }
 0x61f   : > { %v1933_v60 = vpop.permute.xlu1 %1932  ;;  %v1931_v47 = vpop.permute.xlu0 %1930 }
 0x620   : > { %v1943_v2 = vadd.f32 %v1933_v60, %v1898_v59   ;;  %v1942_v3 = vadd.f32 %v1931_v47, %v1897_v46  }
 0x623   : > { %v1937_v62 = vpop.permute.xlu1 %1936  ;;  %v1935_v50 = vpop.permute.xlu0 %1934 }
 0x624   : > { %v1945_v0 = vadd.f32 %v1937_v62, %v1900_v1   ;;  %v1944_v1 = vadd.f32 %v1935_v50, %v1899_v7  }
 0x625 PF: > { %v2572_v54 = vld [vmem:[%s3362_s15] ss:$0 sm:$0xff]  ;;  %v3228_v53 = vmov 0   ;;  %v2573_v8 = vld [vmem:[%s3362_s15 + $0x1] ss:$0 sm:$0xff]  ;;  %vm1974_vm0 = vcmask 130048   ;;  %v3211_v3 = vphi %v3195_v3, %v1942_v3   ;;  %v3207_v2 = vphi %v3191_v2, %v1943_v2   ;;  %v3203_v1 = vphi %v3187_v1, %v1944_v1   ;;  %v3199_v0 = vphi %v3183_v0, %v1945_v0  }
 0x626   : > { %2923 = vset.pattern.permute.xlu0 %v3228_v53  ;;  %2924 = vset.pattern.permute.xlu1 %v3228_v53  ;;  %v2574_v9 = vld [vmem:[%s3367_s9] ss:$0 sm:$0xff]  ;;  %v2575_v10 = vld [vmem:[%s3367_s9 + $0x1] ss:$0 sm:$0xff]  ;;  %v2080_v38 = vld [vmem:[%s4078_s6 + $0x8] sm:$0xff]  ;;  %vm2180_vm1 = vcmask 261120  }
 0x627   : > { %1963 = vperm.xlu0 %2923, %v2572_v54   ;;  %v2577_v11 = vld [vmem:[%s3377_s0 + $0x1] ss:$0 sm:$0xff]  ;;  %v2576_v32 = vld [vmem:[%s3377_s0] ss:$0 sm:$0xff]  ;;  %2605 = vmatprep.subr.mxu0 %v2080_v38  ;;  %s2592_s11 = sshll.u32 %s3099_s27, 2  ;;  %vm2262_vm2 = vcmask 64512  }
 0x628   : > { %2606 = vmatpush3.msra.mxu0 %v2080_v38  ;;  %v2079_v56 = vld [vmem:[%s4078_s6] sm:$0xff]  ;;  %s2278_s30 = sadd.s32 %s3103_s28, %s2592_s11  ;;  %s4108_s20 = sand.u32 1, %s3091_s25  }
 0x629   : > { %2607 = vmatprep.subr.mxu0 %v2079_v56  ;;  %s2587_s17 = sshll.u32 %s2278_s30, 7  ;;  %s4021_s27 = scalar_lea.sflag [#allocation3], %s4108_s20 }
 0x62a   : > { %2608 = vmatpush3.msra.mxu0 %v2079_v56  ;;  %s4013_s19 = scalar_lea.hbm %s4079_s7, %s2587_s17  ;;  %s3229_s22 = smov [#allocation2]  }
 0x62b   : > { %1967 = vperm.xlu0 %2923, %v2573_v8  }
 0x62f   : > { %2044 = vperm.xlu0 %2923, %v2574_v9  }
 0x633   : > { %2048 = vperm.xlu0 %2923, %v2575_v10  }
 0x637   : > { %2072 = vperm.xlu0 %2923, %v2577_v11  }
 0x6a2   : > { %v1964_v51 = vpop.permute.xlu0 %1963 }
 0x6a3   : > { %v1970_v12 = vadd.f32 %v3211_v3, %v1964_v51  ;;  %v1971_v61 = vadd.f32 %v3207_v2, %v1964_v51 }
 0x6a5   : > { %v1975_v13 = vsel %vm1974_vm0, %v1970_v12, 0.0  ;;  %v1976_v52 = vsel %vm1974_vm0, %v1971_v61, 0.0 }
 0x6a6   : > { %v1968_v6 = vpop.permute.xlu0 %1967  ;;  %v1977_v14 = vadd.f32 %v1976_v52, %v1975_v13 }
 0x6a7   : > { %v1972_v16 = vadd.f32 %v3203_v1, %v1968_v6  ;;  %v1973_v23 = vadd.f32 %v3199_v0, %v1968_v6 }
 0x6a9   : > { %v1978_v4 = vsel %vm1974_vm0, %v1972_v16, 0.0  ;;  %v1980_v19 = vsel %vm1974_vm0, %v1973_v23, 0.0 }
 0x6aa   : > { %v1979_v5 = vadd.f32 %v1978_v4, %v1977_v14  ;;  %v2045_v36 = vpop.permute.xlu0 %2044 }
 0x6ac   : > { %v1981_v24 = vadd.f32 %v1980_v19, %v1979_v5 }
 0x6ae   : > { %1982 = vadd.xlane.f32.xlu1 %v1981_v24  ;;  %v2049_v44 = vpop.permute.xlu0 %2048 }
 0x6b2   : > { %v2073_v9 = vpop.permute.xlu0 %2072 }
 0x737   : > { %v1983_v25 = vpop.xlane.xlu1 %1982 }
 0x738   : > { %v1984_v63 = vrot.slane %v1983_v25, 4 }
 0x73a   : > { %v1985_v26 = vadd.f32 %v1984_v63, %v1983_v25 }
 0x73c   : > { %v1986_v17 = vrot.slane %v1985_v26, 2 }
 0x73e   : > { %v1987_v2 = vadd.f32 %v1986_v17, %v1985_v26 }
 0x740   : > { %v1988_v3 = vrot.slane %v1987_v2, 1 }
 0x742   : > { %v1989_v22 = vadd.f32 %v1988_v3, %v1987_v2 }
 0x744   : > { %2627 = vpush %v1989_v22 }
 0x775   : > { %s2628_s12 = spop %2627 }
 0x776   : > { %s1993_s15 = smul.f32 0.001953125, %s2628_s12  ;;  %s2281_s12 = sshll.u32 %s3382_s26, 4  ;;  %s4015_s12 = int_to_ptr.vmem [resolvable:$true] %s2281_s12 }
 0x777   : > { %s2927_s28 = scalar_lea.vmem %s4015_s12, 256 }
 0x778   : > { %v1994_v29 = vstv %s1993_s15  ;;  %p2928_p10 = scmp.ne.s32.totalorder %s4015_s12, %s2927_s28 }
 0x779   : > { %v1995_v0 = vsub.f32 %v1970_v12, %v1994_v29  ;;  %v1996_v30 = vsub.f32 %v1971_v61, %v1994_v29  ;;  %v1997_v18 = vsub.f32 %v1972_v16, %v1994_v29  ;;  %v1998_v40 = vsub.f32 %v1973_v23, %v1994_v29  ;;  %v2178_v12 = vld [vmem:[%s4077_s5] sm:$0xff]  ;;  %v2179_v16 = vld [vmem:[%s4077_s5 + $0x8] sm:$0xff] }
 0x77a   : > { %2623 = vmatprep.mubr.msk.f32.mxu1 %vm2180_vm1, %v2178_v12  ;;  %p2929_p11 = pnand %p2928_p10, %p3324_p3 }
 0x77b   : > { %v1999_v27 = vmul.f32 %v1995_v0, %v1995_v0  ;;  %v2000_v20 = vmul.f32 %v1996_v30, %v1996_v30  ;;  %v2001_v21 = vmul.f32 %v1997_v18, %v1997_v18  ;;  %v2002_v34 = vmul.f32 %v1998_v40, %v1998_v40 }
 0x77c   : > { %p2930_p12 = pneg %p2929_p11 }
 0x77d   : > { %v2003_v41 = vsel %vm1974_vm0, %v1999_v27, 0.0  ;;  %v2004_v42 = vsel %vm1974_vm0, %v2000_v20, 0.0  ;;  %v2006_v15 = vsel %vm1974_vm0, %v2001_v21, 0.0  ;;  %v2008_v31 = vsel %vm1974_vm0, %v2002_v34, 0.0 }
 0x77e   : > { %v2005_v43 = vadd.f32 %v2004_v42, %v2003_v41 }
 0x780   : > { %v2007_v33 = vadd.f32 %v2006_v15, %v2005_v43 }
 0x782   : > { %v2009_v39 = vadd.f32 %v2008_v31, %v2007_v33 }
 0x784   : > { %2010 = vadd.xlane.f32.xlu1 %v2009_v39 }
 0x795   : > { %2068 = vperm.xlu1 %2924, %v2576_v32  }
 0x80d   : > { %v2011_v45 = vpop.xlane.xlu1 %2010 }
 0x80e   : > { %v2012_v37 = vrot.slane %v2011_v45, 4 }
 0x810   : > { %v2013_v48 = vadd.f32 %v2012_v37, %v2011_v45 }
 0x811   : > { %v2069_v7 = vpop.permute.xlu1 %2068 }
 0x812   : > { %v2014_v55 = vrot.slane %v2013_v48, 2 }
 0x814   : > { %v2015_v35 = vadd.f32 %v2014_v55, %v2013_v48 }
 0x816   : > { %v2016_v49 = vrot.slane %v2015_v35, 1 }
 0x818   : > { %v2017_v57 = vadd.f32 %v2016_v49, %v2015_v35 }
 0x81a   : > { %2629 = vpush %v2017_v57 }
 0x84b   : > { %s2630_s0 = spop %2629 }
 0x84c   : > { %s2021_s23 = smul.f32 0.001953125, %s2630_s0  ;;  %s2931_s0 = sshll.u32 %s3229_s22, 4  ;;  %s2932_s0 = int_to_ptr.vmem [resolvable:$false] %s2931_s0 }
 0x84d   : > { %p2934_p13 = scmp.lt.s32.totalorder %s4015_s12, %s2932_s0 }
 0x84e   : > { %s2022_s21 = sadd.f32 1e-05, %s2021_s23  ;;  %s2933_s23 = scalar_lea.vmem %s2932_s0, 512 }
 0x84f   : > { %p2935_p0 = scmp.lt.s32.totalorder %s2933_s23, %s2927_s28 }
 0x850   : > { %v2023_v58 = vstv %s2022_s21 }
 0x851   : > { %2925 = vrsqrt.f32 %v2023_v58  ;;  %p2936_p1 = por %p2935_p0, %p2934_p13 }
 0x853   : > { %p2937_p2 = pnand %p2936_p1, %p2930_p12 }
 0x85e   : > { %v2926_v28 = vpop.eup %2925 }
 0x85f   : > { %2631 = vpush %v2926_v28 }
 0x890   : > { %s2632_s10 = spop %2631 }
 0x891   : > { %v2026_v59 = vstv %s2632_s10 }
 0x892   : > { %v2027_v46 = vmul.f32 %v2026_v59, %v1995_v0  ;;  %v2028_v60 = vmul.f32 %v2026_v59, %v1996_v30  ;;  %v2029_v47 = vmul.f32 %v2026_v59, %v1997_v18  ;;  %v2030_v1 = vmul.f32 %v2026_v59, %v1998_v40 }
 0x894   : > { %v2053_v62 = vmul.f32 %v2049_v44, %v2029_v47  ;;  %v2051_v50 = vmul.f32 %v2045_v36, %v2027_v46  ;;  %v2052_v54 = vmul.f32 %v2045_v36, %v2028_v60  ;;  %v2054_v10 = vmul.f32 %v2049_v44, %v2030_v1 }
 0x896   : > { %v2075_v53 = vadd.f32 %v2069_v7, %v2051_v50  ;;  %v2076_v8 = vadd.f32 %v2069_v7, %v2052_v54  ;;  %v2077_v11 = vadd.f32 %v2073_v9, %v2053_v62  ;;  %v2078_v51 = vadd.f32 %v2073_v9, %v2054_v10 }
 0x898   : > { %2609 = vmatprep.mubr.msk.f32.mxu0 %vm1974_vm0, %v2075_v53 }
 0x899   : > { %2610 = vmatmul.mubr.msk.f32.vlgmr.msra.gmra.mxu0 %vm1974_vm0, %v2076_v8 }
 0x89a   : > { %2612 = vmatprep.mubr.msk.f32.mxu0 %vm1974_vm0, %v2077_v11 }
 0x89d   : > { %2613 = vmatmul.mubr.msk.f32.gmra.mxu0 %vm1974_vm0, %v2078_v51 }
 0x959   : > { %v2611_v61 = vpop.f32.mrf.mxu0 }
 0x95b   : > { %v2159_v13 = vpop.f32.mrf.mxu0 }
 0x95d   : > { %v2614_v52 = vpop.f32.mrf.mxu0 }
 0x95e   : > { %2615 = vmatprep.subr.mxu1 %v2614_v52 }
 0x95f   : > { %v2169_v6 = vpop.f32.mrf.mxu0  ;;  %2616 = vmatpush3.msra.mxu1 %v2614_v52 }
 0x960   : > { %2617 = vmatprep.subr.mxu1 %v2169_v6 }
 0x961   : > { %2618 = vmatpush3.msra.mxu1 %v2169_v6 }
 0x962   : > { %2619 = vmatprep.subr.mxu1 %v2611_v61 }
 0x963   : > { %2620 = vmatpush3.msra.mxu1 %v2611_v61 }
 0x964   : > { %2621 = vmatprep.subr.mxu1 %v2159_v13 }
 0x965   : > { %2622 = vmatpush3.msra.mxu1 %v2159_v13 }
 0x966   : > { %2624 = vmatmul.mubr.msk.f32.vlgmr.msra.gmra.mxu1 %vm2180_vm1, %v2179_v16 }
 0xa26   : > { %v2625_v23 = vpop.f32.mrf.mxu1 }
 0xa27   : > { %2264 = vst.msk [vmem:[%s3382_s26 + $0x8] sm:$0xff] %vm2262_vm2, %v2625_v23 }
 0xa28   : > { %v2253_v14 = vpop.f32.mrf.mxu1 }
 0xa29   : > { %2263 = vst.msk [vmem:[%s3382_s26] sm:$0xff] %vm2262_vm2, %v2253_v14 }
 0xa2a   : > { %2940 = shalt.err (!%p2937_p2)
}
 0xa2b   : > { %s2941_s26 = scalar_lea.hbm %s4013_s19, 256  ;;  %s2945_s13 = scalar_lea.hbm %s4079_s7, 2048 }
 0xa2c   : > { %p2942_p4 = scmp.ne.s32.totalorder %s4013_s19, %s2941_s26  ;;  %p2946_p7 = scmp.lt.s32.totalorder %s4013_s19, %s4079_s7 }
 0xa2d   : > { %p2947_p9 = scmp.lt.s32.totalorder %s2945_s13, %s2941_s26 }
 0xa2e   : > { %p2943_p5 = pnand %p2942_p4, %p3324_p3 }
 0xa2f   : > { %p2948_p10 = por %p2947_p9, %p2946_p7 }
 0xa30   : > { %p2944_p6 = pneg %p2943_p5 }
 0xa32   : > { %p2949_p11 = pnand %p2948_p10, %p2944_p6 }
 0xa34   : > { %2952 = shalt.err (!%p2949_p11)
}
 0xa35   : > { %s3230_s29 = smov 128   ;;  %s3231_s11 = smov 256  }
 0xa36   : > { %s3232_s30 = smov 8  }
 0xa37   : > { %2633 = dma.vmem_to_hbm [thread:$0]  (%p3324_p3), %s4015_s12, 256, %s4013_s19, %s4021_s27, %s3230_s29, %s3231_s11, %s3232_s30  }
 0xa38 PF: > { %p2639_p12 = scmp.ge.s32.totalorder %s3115_s8, 2  ;;  %s2296_s15 = sand.u32 1, %s3087_s24  }
 0xa39   : > { %s2297_s9 = scalar_lea.sflag [#allocation3], %s2296_s15 }
 0xa3a   : > { %p2636_p13 = pnand %p2639_p12, %p3333_p8 }
 0xa3c   : > { %p2637_p0 = pneg %p2636_p13 }
 0xa3e   : > { %3082 = dma.done.wait (%p2637_p0), %s2297_s9, 256  }
 0xa3f   : > { %3084 = vsyncadd (%p2637_p0), %s2297_s9, 4294967040  ;;  %s20_s8 = sadd.s32 1, %s3115_s8   ;;  %s4110_s20 = sld [smem:[#allocation5_spill]] }
 0xa40   : > { %p17_p1 = scmp.ge.s32.totalorder %s20_s8, 10   ;;  %s4111_s26 = sld [smem:[#allocation11_spill]] }
 0xa41   : > { %s4112_s27 = sld [smem:[#allocation6_spill]]  ;;  %s4116_s24 = smov %s3091_s25 }
 0xa42   : > { %s4113_s28 = sld [smem:[#allocation7_spill]]  ;;  %19 = sbr.rel (!%p17_p1) target bundleno = 7 (0x7), region = 151 }
 0xa43   : > { %s4114_s29 = sld [smem:[#allocation8_spill]] }
 0xa44   : > { %s4115_s30 = sld [smem:[#allocation9_spill]] }
 0xa45   : > { %s4117_s25 = smov %s4110_s20 }
 0xa47   :  { %2302 = vsyncpa [#allocation3], 1 }
 0xa48   :  { %2304 = vsyncpa [#allocation3 + $0x1], 1 }

</bundles_post_ra>
